<compile_context>
chip_gen: v5e
topology: v5e:2x2
jax: 0.10.0
libtpu: 0.0.40
codegen_flags: <defaults>
</compile_context>

<pallas_src>
import math
from functools import partial

import jax
import jax.numpy as jnp
from jax.experimental import pallas as pl
from jax.experimental.pallas import tpu as pltpu

LANE = 128
BN_EPS = 1e-5
LRELU_SLOPE = 0.2
VMEM_LIMIT = 48 * 1024 * 1024


def _round_up(x, m):
    return (x + m - 1) // m * m


def _pick_rows(n_img, mm, target):
    """Rows per grid block for a flat (n_img*mm, C) operand (must divide it)."""
    if mm >= target:
        return target if mm % target == 0 else mm
    best = mm
    for d in range(1, n_img + 1):
        if n_img % d == 0 and d * mm <= target:
            best = d * mm
    return best


def _pick_images(n_img, mm, target_rows=1024, max_imgs=8):
    """Images per conv grid block (divisor of n_img, bounded unroll)."""
    best = 1
    for d in range(1, n_img + 1):
        if n_img % d == 0 and d <= max_imgs and d * mm <= target_rows:
            best = d
    return best


# ----------------------------- Pallas kernels ------------------------------

def _conv0_stats_kernel(x_ref, w_ref, y_ref, st_ref):
    """Layer-0 conv as ONE MXU matmul over a compact im2col + BN partials.

    x_ref:  (TR, K_pad)        bf16 im2col rows (K = 16*nc padded to 128)
    w_ref:  (K_pad, Cout_pad)  bf16
    y_ref:  (TR, Cout_pad)     bf16 conv output
    st_ref: (1, 2, Cout_pad)   f32  [col-sum, M2 about this block's col-mean]
    """
    acc = jnp.dot(x_ref[...], w_ref[...], preferred_element_type=jnp.float32)
    y_ref[...] = acc.astype(y_ref.dtype)
    rows = acc.shape[0]
    colsum = jnp.sum(acc, axis=0, keepdims=True)
    mu = colsum * (1.0 / rows)
    d = acc - mu
    st_ref[0, 0:1, :] = colsum
    st_ref[0, 1:2, :] = jnp.sum(d * d, axis=0, keepdims=True)


def _conv_pair_stats_kernel(x_ref, w_ref, y_ref, st_ref, acc_ref, *, ow2, mm2, nimg):
    """Direct conv (k=4, s=2, p=1) as 8 paired-tap MXU dots (K = 2*Cin_pad).

    x_ref:  (4, B, (OH2+1)*OW2, 2*Cin_pad) bf16 paired-tap slabs (B images)
    w_ref:  (8, 2*Cin_pad, Cout_pad)       bf16 paired-tap weights
    y_ref:  (B, MM2, Cout_pad)             bf16 conv output (flat spatial)
    st_ref: (B, 2, Cout_pad)               f32  per-image [sum, M2 about mean]
    acc_ref:(MM2, Cout_pad)                f32  VMEM scratch accumulator
    """
    for b in range(nimg):
        for idx in range(8):                       # idx = qh*4 + rw*2 + qw
            qh, s = idx // 4, idx % 4
            xs = x_ref[s, b, pl.ds(qh * ow2, mm2), :]           # (MM2, 2*Cin_pad)
            contrib = jnp.dot(xs, w_ref[idx],
                              preferred_element_type=jnp.float32)
            if idx == 0:
                acc_ref[...] = contrib
            else:
                acc_ref[...] += contrib
        acc = acc_ref[...]
        y_ref[b] = acc.astype(y_ref.dtype)
        colsum = jnp.sum(acc, axis=0, keepdims=True)
        mu = colsum * (1.0 / mm2)
        d = acc - mu
        st_ref[b, 0:1, :] = colsum
        st_ref[b, 1:2, :] = jnp.sum(d * d, axis=0, keepdims=True)


def _bn_lrelu_kernel(y_ref, sc_ref, sh_ref, o_ref):
    """Folded BatchNorm (scale/shift) + LeakyReLU(0.2) on flat row tiles."""
    z = y_ref[...].astype(jnp.float32) * sc_ref[...] + sh_ref[...]
    o_ref[...] = jnp.where(z > 0, z, LRELU_SLOPE * z).astype(o_ref.dtype)


def _bn_lrelu_head_kernel(y_ref, sc_ref, sh_ref, wh_ref, o_ref):
    """Last block: BN + LeakyReLU fused with the 4x4 disc-head conv + Sigmoid.

    Single grid step over the whole batch; lane-dense (N, 128) output.
    """
    z = y_ref[...].astype(jnp.float32) * sc_ref[...] + sh_ref[...]   # (N,16,C)
    a = jnp.where(z > 0, z, LRELU_SLOPE * z)
    t = jnp.sum(a * wh_ref[...], axis=2)                             # (N, 16)
    logits = jnp.sum(t, axis=1, keepdims=True)                       # (N, 1)
    o_ref[...] = jnp.broadcast_to(jax.nn.sigmoid(logits), o_ref.shape)


# --------------------------- pallas_call wrappers ---------------------------

def conv0_stats_pallas(cols, w0, tr):
    rows, kp = cols.shape
    cout_pad = w0.shape[1]
    g = rows // tr
    return pl.pallas_call(
        _conv0_stats_kernel,
        grid=(g,),
        in_specs=[
            pl.BlockSpec((tr, kp), lambda i: (i, 0)),
            pl.BlockSpec((kp, cout_pad), lambda i: (0, 0)),     # constant: one fetch
        ],
        out_specs=(
            pl.BlockSpec((tr, cout_pad), lambda i: (i, 0)),
            pl.BlockSpec((1, 2, cout_pad), lambda i: (i, 0, 0)),
        ),
        out_shape=(
            jax.ShapeDtypeStruct((rows, cout_pad), jnp.bfloat16),
            jax.ShapeDtypeStruct((g, 2, cout_pad), jnp.float32),
        ),
        compiler_params=pltpu.CompilerParams(
            dimension_semantics=("parallel",),
            vmem_limit_bytes=VMEM_LIMIT,
        ),
    )(cols, w0)


def conv_pair_stats_pallas(slabs, w_pair, mm2, ow2, nimg):
    _, n, rows, k2 = slabs.shape
    cout_pad = w_pair.shape[2]
    return pl.pallas_call(
        partial(_conv_pair_stats_kernel, ow2=ow2, mm2=mm2, nimg=nimg),
        grid=(n // nimg,),
        in_specs=[
            pl.BlockSpec((4, nimg, rows, k2), lambda i: (0, i, 0, 0)),
            pl.BlockSpec((8, k2, cout_pad), lambda i: (0, 0, 0)),  # constant: one fetch
        ],
        out_specs=(
            pl.BlockSpec((nimg, mm2, cout_pad), lambda i: (i, 0, 0)),
            pl.BlockSpec((nimg, 2, cout_pad), lambda i: (i, 0, 0)),
        ),
        out_shape=(
            jax.ShapeDtypeStruct((n, mm2, cout_pad), jnp.bfloat16),
            jax.ShapeDtypeStruct((n, 2, cout_pad), jnp.float32),
        ),
        scratch_shapes=[pltpu.VMEM((mm2, cout_pad), jnp.float32)],
        compiler_params=pltpu.CompilerParams(
            dimension_semantics=("parallel",),
            vmem_limit_bytes=VMEM_LIMIT,
        ),
    )(slabs, w_pair)


def bn_lrelu_pallas(y_flat, scale, shift, tr):
    rows, cpad = y_flat.shape
    return pl.pallas_call(
        _bn_lrelu_kernel,
        grid=(rows // tr,),
        in_specs=[
            pl.BlockSpec((tr, cpad), lambda i: (i, 0)),
            pl.BlockSpec((1, cpad), lambda i: (0, 0)),
            pl.BlockSpec((1, cpad), lambda i: (0, 0)),
        ],
        out_specs=pl.BlockSpec((tr, cpad), lambda i: (i, 0)),
        out_shape=jax.ShapeDtypeStruct((rows, cpad), jnp.bfloat16),
        compiler_params=pltpu.CompilerParams(
            dimension_semantics=("parallel",),
            vmem_limit_bytes=VMEM_LIMIT,
        ),
    )(y_flat, scale, shift)


def bn_lrelu_head_pallas(y, scale, shift, wh_flat):
    n, mm, cpad = y.shape
    return pl.pallas_call(
        _bn_lrelu_head_kernel,
        grid=(1,),
        in_specs=[
            pl.BlockSpec((n, mm, cpad), lambda i: (0, 0, 0)),
            pl.BlockSpec((1, cpad), lambda i: (0, 0)),
            pl.BlockSpec((1, cpad), lambda i: (0, 0)),
            pl.BlockSpec((mm, cpad), lambda i: (0, 0)),
        ],
        out_specs=pl.BlockSpec((n, LANE), lambda i: (0, 0)),
        out_shape=jax.ShapeDtypeStruct((n, LANE), jnp.float32),
        compiler_params=pltpu.CompilerParams(
            dimension_semantics=("arbitrary",),
            vmem_limit_bytes=VMEM_LIMIT,
        ),
    )(y, scale, shift, wh_flat)


# ------------------------------ JAX glue ------------------------------------

def l2normalize(v, eps=1e-12):
    return v / (jnp.linalg.norm(v) + eps)


def spectral_normalize(w_bar, u, v):
    """One power iteration (power_iterations=1), exactly SpectralNorm._update_u_v."""
    h = w_bar.shape[0]
    w_flat = w_bar.reshape(h, -1)
    v = l2normalize(w_flat.T @ u)
    u = l2normalize(w_flat @ v)
    sigma = jnp.dot(u, w_flat @ v)
    return w_bar / sigma


def _im2col_k4s2p1(x):
    """x (N, H, W, nc) -> (N*OH*OW, 16*nc) im2col for conv k=4 s=2 p=1."""
    n, h, w, c = x.shape
    oh, ow = h // 2, w // 2
    xp = jnp.pad(x, ((0, 0), (1, 1), (1, 1), (0, 0)))
    cols = []
    for kh in range(4):
        for kw in range(4):
            cols.append(xp[:, kh::2, kw::2, :][:, :oh, :ow, :])
    col = jnp.concatenate(cols, axis=-1)                 # (N, OH, OW, 16*nc)
    return col.reshape(n * oh * ow, 16 * c)


def _build_pair_slabs(act, oh2):
    """act (N, H, W, Cp) NHWC -> (4, N, (OH2+1)*OW2, 2*Cp) paired-tap slabs.

    Row-pair plane RP[p, c, :Cp]  = pad_act[2p,   c]   (kh even / rh=0 half)
                   RP[p, c, Cp:]  = pad_act[2p+1, c]   (kh odd  / rh=1 half)
    Slab s = rw*2 + qw holds columns (2q + 2*qw + rw) of RP, q in [0, OW2).
    Tap pair (qh, rw, qw) reads contiguous slab rows [qh*OW2, qh*OW2 + MM2).
    """
    n, h, w, cp = act.shape
    ow2 = w // 2
    xp = jnp.pad(act, ((0, 0), (1, 1), (1, 1), (0, 0)))              # (N,H+2,W+2,Cp)
    rp = xp.reshape(n, oh2 + 1, 2, w + 2, cp)
    rp = jnp.swapaxes(rp, 2, 3).reshape(n, oh2 + 1, w + 2, 2 * cp)
    slabs = []
    for rw in (0, 1):
        for qw in (0, 1):
            c0 = 2 * qw + rw
            s = rp[:, :, c0::2, :][:, :, :ow2, :]                    # (N,OH2+1,OW2,2Cp)
            slabs.append(s.reshape(n, (oh2 + 1) * ow2, 2 * cp))
    return jnp.stack(slabs, axis=0)


def _pair_weights(w, cin_pad, cout_pad):
    """w (Cout, Cin, 4, 4) -> (8, 2*Cin_pad, Cout_pad) paired-tap bf16 weights."""
    cout, cin = w.shape[0], w.shape[1]
    wt = jnp.transpose(w, (2, 3, 1, 0))                              # (kh, kw, Cin, Cout)
    wt = jnp.pad(wt, ((0, 0), (0, 0), (0, cin_pad - cin), (0, cout_pad - cout)))
    pairs = []
    for qh in (0, 1):
        for rw in (0, 1):
            for qw in (0, 1):
                kw = 2 * qw + rw
                pairs.append(jnp.concatenate([wt[2 * qh, kw], wt[2 * qh + 1, kw]],
                                             axis=0))
    return jnp.stack(pairs, axis=0).astype(jnp.bfloat16)


def _combine_stats(stats, count):
    """Equal-count Chan/Welford combine of per-group (sum, M2) -> (mean, var)."""
    s = stats.reshape(-1, 2, stats.shape[-1]).astype(jnp.float32)
    sums, m2s = s[:, 0, :], s[:, 1, :]
    g = s.shape[0]
    total = g * count
    gmean = jnp.sum(sums, axis=0) / total
    means = sums / count
    m2 = jnp.sum(m2s, axis=0) + count * jnp.sum((means - gmean) ** 2, axis=0)
    var = jnp.maximum(m2 / total, 0.0)
    return gmean, var


def dcgan_discriminator_forward(x_nchw, params):
    """Equivalent of DCGANDiscriminator.forward with discriminator_head=True."""
    n = x_nchw.shape[0]
    x = jnp.transpose(x_nchw, (0, 2, 3, 1)).astype(jnp.float32)      # NHWC
    nblocks = len(params["blocks"])
    act4d = None
    out = None

    for li, blk in enumerate(params["blocks"]):
        w = spectral_normalize(blk["w_bar"], blk["u"], blk["v"])     # (Cout, Cin, 4, 4)
        cout, cin = int(w.shape[0]), int(w.shape[1])
        cout_pad = _round_up(cout, LANE)

        if li == 0:
            # Compact im2col: K = 16*nc padded once to 128; one dot per tile.
            h = x.shape[1]
            oh = h // 2
            mm = oh * oh
            k0 = 16 * cin
            k0_pad = _round_up(k0, LANE)
            cols = _im2col_k4s2p1(x.astype(jnp.bfloat16))            # (N*MM, 16*nc)
            cols = jnp.pad(cols, ((0, 0), (0, k0_pad - k0)))
            w0 = jnp.transpose(w, (2, 3, 1, 0)).reshape(k0, cout)
            w0 = jnp.pad(w0, ((0, k0_pad - k0), (0, cout_pad - cout)))
            w0 = w0.astype(jnp.bfloat16)
            tr0 = _pick_rows(n, mm, target=512)
            y_flat, stats = conv0_stats_pallas(cols, w0, tr0)        # bf16 y
            group_cnt = tr0
            y3d = y_flat.reshape(n, mm, cout_pad)
        else:
            oh = act4d.shape[1] // 2
            mm = oh * oh
            cin_pad = act4d.shape[3]
            slabs = _build_pair_slabs(act4d, oh)                     # bf16 slabs
            w_pair = _pair_weights(w, cin_pad, cout_pad)
            nimg = _pick_images(n, mm)
            y3d, stats = conv_pair_stats_pallas(slabs, w_pair, mm, oh, nimg)
            group_cnt = mm
            y_flat = y3d.reshape(n * mm, cout_pad)

        # BatchNorm (training-mode batch statistics) folded into scale/shift.
        mean, var = _combine_stats(stats, group_cnt)
        gamma = jnp.pad(blk["gamma"], (0, cout_pad - cout))          # pad chans -> 0
        beta = jnp.pad(blk["beta"], (0, cout_pad - cout))
        scale = (gamma * jax.lax.rsqrt(var + BN_EPS)).astype(jnp.float32)
        shift = (beta - mean * scale).astype(jnp.float32)
        scale2 = scale.reshape(1, cout_pad)
        shift2 = shift.reshape(1, cout_pad)

        if li < nblocks - 1:
            tr = _pick_rows(n, mm, target=1024)
            act_flat = bn_lrelu_pallas(y_flat, scale2, shift2, tr)
            act4d = act_flat.reshape(n, oh, oh, cout_pad)
        else:
            # Fuse disc head (SpectralNorm(Conv2d(C,1,4,1,0)) -> Sigmoid) into
            # the last BN/LeakyReLU pass; last activation is always 4x4.
            assert oh == 4 and mm == 16
            wh = spectral_normalize(params["head"]["w_bar"],
                                    params["head"]["u"], params["head"]["v"])
            wh_flat = jnp.transpose(wh[0], (1, 2, 0)).reshape(16, cout)
            wh_flat = jnp.pad(wh_flat, ((0, 0), (0, cout_pad - cout)))
            wh_flat = wh_flat.astype(jnp.float32)
            head = bn_lrelu_head_pallas(y3d, scale2, shift2, wh_flat)  # (N, 128)
            out = head[:, 0]
    return out                                                       # (N,)


def init_params(key, img_size, ndf, nc):
    """Deterministic synthetic init matching DCGANDiscriminator.__init__ shapes/dists."""
    log_first = int(math.log2(img_size)) - 3
    blocks = []
    prev = nc
    k = key
    for i in range(log_first + 1):
        cout = ndf * 2 ** i
        k, k1, k2, k3, k4 = jax.random.split(k, 5)
        blocks.append(dict(
            w_bar=0.02 * jax.random.normal(k1, (cout, prev, 4, 4), jnp.float32),
            u=l2normalize(jax.random.normal(k2, (cout,), jnp.float32)),
            v=l2normalize(jax.random.normal(k3, (prev * 16,), jnp.float32)),
            gamma=1.0 + 0.02 * jax.random.normal(k4, (cout,), jnp.float32),
            beta=jnp.zeros((cout,), jnp.float32),
        ))
        prev = cout
    k, k1, k2, k3 = jax.random.split(k, 4)
    head = dict(
        w_bar=0.02 * jax.random.normal(k1, (1, prev, 4, 4), jnp.float32),
        u=l2normalize(jax.random.normal(k2, (1,), jnp.float32)),
        v=l2normalize(jax.random.normal(k3, (prev * 16,), jnp.float32)),
    )
    return dict(blocks=blocks, head=head)


def reference_forward(x_nchw, params):
    """Pure-JAX f32 reference (train-mode BN) for correctness checking."""
    out = x_nchw.astype(jnp.float32)
    for blk in params["blocks"]:
        w = spectral_normalize(blk["w_bar"], blk["u"], blk["v"])
        y = jax.lax.conv_general_dilated(
            out, w, window_strides=(2, 2), padding=((1, 1), (1, 1)),
            dimension_numbers=("NCHW", "OIHW", "NCHW"))
        mean = jnp.mean(y, axis=(0, 2, 3), keepdims=True)
        var = jnp.mean((y - mean) ** 2, axis=(0, 2, 3), keepdims=True)
        z = (y - mean) * jax.lax.rsqrt(var + BN_EPS)
        z = z * blk["gamma"].reshape(1, -1, 1, 1) + blk["beta"].reshape(1, -1, 1, 1)
        out = jnp.where(z > 0, z, LRELU_SLOPE * z)
    wh = spectral_normalize(params["head"]["w_bar"], params["head"]["u"],
                            params["head"]["v"])
    y = jax.lax.conv_general_dilated(
        out, wh, window_strides=(1, 1), padding=((0, 0), (0, 0)),
        dimension_numbers=("NCHW", "OIHW", "NCHW"))
    return jax.nn.sigmoid(y.reshape(-1))


if __name__ == "__main__":
    # Small config consistent with the module: img_size=16 -> 2 conv blocks + head.
    img_size, ndf, nc, batch = 16, 8, 1, 2
    key = jax.random.PRNGKey(0)
    params = init_params(key, img_size, ndf, nc)
    x = jax.random.normal(jax.random.fold_in(key, 999),
                          (batch, nc, img_size, img_size), dtype=jnp.float32)

    fwd = jax.jit(dcgan_discriminator_forward)
    out = jax.block_until_ready(fwd(x, params))

    assert out.shape == (batch,)
    assert bool(jnp.all(jnp.isfinite(out)))
    assert bool(jnp.all((out > 0.0) & (out < 1.0)))      # sigmoid output

    ref = jax.block_until_ready(jax.jit(reference_forward)(x, params))
    assert bool(jnp.allclose(out, ref, atol=5e-2)), (out, ref)

    print("KERNEL_OK")
</pallas_src>

<mosaic_0001>
module attributes {stable_mosaic.version = 11 : i64} {
  func.func @_conv0_stats_kernel(%arg0: i32, %arg1: memref<128x128xbf16, #tpu.memory_space<vmem>>, %arg2: memref<128x128xbf16, #tpu.memory_space<vmem>>, %arg3: memref<128x128xbf16, #tpu.memory_space<vmem>>, %arg4: memref<1x2x128xf32, #tpu.memory_space<vmem>>) attributes {dimension_semantics = [#tpu.dimension_semantics<parallel>], iteration_bounds = array<i64: 1>, scalar_prefetch = 0 : i64, scratch_operands = 0 : i64, tpu.core_type = #tpu.core_type<tc>, window_params = [{transform_indices = @transform_0, window_bounds = array<i64: 128, 128>}, {pipeline_mode = #tpu.pipeline_mode<synchronous>, transform_indices = @transform_1, window_bounds = array<i64: 128, 128>}, {transform_indices = @transform_2, window_bounds = array<i64: 128, 128>}, {transform_indices = @transform_3, window_bounds = array<i64: 1, 2, 128>}]} {
    %c0 = arith.constant 0 : index
    %c0_0 = arith.constant 0 : index
    %0 = vector.load %arg1[%c0, %c0_0] : memref<128x128xbf16, #tpu.memory_space<vmem>>, vector<128x128xbf16>
    %c0_1 = arith.constant 0 : index
    %c0_2 = arith.constant 0 : index
    %1 = vector.load %arg2[%c0_1, %c0_2] : memref<128x128xbf16, #tpu.memory_space<vmem>>, vector<128x128xbf16>
    %cst = arith.constant dense<0.000000e+00> : vector<128x128xf32>
    %2 = tpu.matmul %0, %1, %cst {dimension_numbers = #tpu.dot_dimension_numbers<[1], [0], [0], [1], [0, 0, 1, 1], [], []>} : vector<128x128xbf16>, vector<128x128xbf16>, vector<128x128xf32> -> vector<128x128xf32>
    %3 = arith.truncf %2 : vector<128x128xf32> to vector<128x128xbf16>
    %c0_3 = arith.constant 0 : index
    %c0_4 = arith.constant 0 : index
    %4 = vector.load %arg3[%c0_3, %c0_4] : memref<128x128xbf16, #tpu.memory_space<vmem>>, vector<128x128xbf16>
    tpu.vector_store %arg3[%c0_3, %c0_4], %3 {strides = array<i32>} : memref<128x128xbf16, #tpu.memory_space<vmem>>, vector<128x128xbf16>,
    %cst_5 = arith.constant dense<0.000000e+00> : vector<128xf32>
    %5 = vector.multi_reduction <add>, %2, %cst_5 [0] : vector<128x128xf32> to vector<128xf32>
    %6 = vector.shape_cast %5 : vector<128xf32> to vector<1x128xf32>
    %cst_6 = arith.constant 7.812500e-03 : f32
    %7 = vector.broadcast %cst_6 : f32 to vector<1x128xf32>
    %8 = arith.mulf %6, %7 : vector<1x128xf32>
    %9 = vector.broadcast %8 : vector<1x128xf32> to vector<128x128xf32>
    %10 = arith.subf %2, %9 : vector<128x128xf32>
    %c0_7 = arith.constant 0 : index
    %c0_8 = arith.constant 0 : index
    %c0_9 = arith.constant 0 : index
    %11 = vector.load %arg4[%c0_7, %c0_8, %c0_9] : memref<1x2x128xf32, #tpu.memory_space<vmem>>, vector<1x1x128xf32>
    %12 = vector.shape_cast %11 : vector<1x1x128xf32> to vector<1x128xf32>
    %13 = vector.shape_cast %6 : vector<1x128xf32> to vector<1x1x128xf32>
    tpu.vector_store %arg4[%c0_7, %c0_8, %c0_9], %13 {strides = array<i32>} : memref<1x2x128xf32, #tpu.memory_space<vmem>>, vector<1x1x128xf32>,
    %14 = arith.mulf %10, %10 : vector<128x128xf32>
    %cst_10 = arith.constant dense<0.000000e+00> : vector<128xf32>
    %15 = vector.multi_reduction <add>, %14, %cst_10 [0] : vector<128x128xf32> to vector<128xf32>
    %16 = vector.shape_cast %15 : vector<128xf32> to vector<1x128xf32>
    %c0_11 = arith.constant 0 : index
    %c1 = arith.constant 1 : index
    %c0_12 = arith.constant 0 : index
    %17 = vector.load %arg4[%c0_11, %c1, %c0_12] : memref<1x2x128xf32, #tpu.memory_space<vmem>>, vector<1x1x128xf32>
    %18 = vector.shape_cast %17 : vector<1x1x128xf32> to vector<1x128xf32>
    %19 = vector.shape_cast %16 : vector<1x128xf32> to vector<1x1x128xf32>
    tpu.vector_store %arg4[%c0_11, %c1, %c0_12], %19 {strides = array<i32>} : memref<1x2x128xf32, #tpu.memory_space<vmem>>, vector<1x1x128xf32>,
    return
  }
  func.func @transform_0(%arg0: i32) -> (i32, i32) {
    %c0_i32 = arith.constant 0 : i32
    %c0_i32_0 = arith.constant 0 : i32
    return %arg0, %c0_i32 : i32, i32
  }
  func.func @transform_1(%arg0: i32) -> (i32, i32) {
    %c0_i32 = arith.constant 0 : i32
    %c0_i32_0 = arith.constant 0 : i32
    %c0_i32_1 = arith.constant 0 : i32
    return %c0_i32, %c0_i32_0 : i32, i32
  }
  func.func @transform_2(%arg0: i32) -> (i32, i32) {
    %c0_i32 = arith.constant 0 : i32
    %c0_i32_0 = arith.constant 0 : i32
    return %arg0, %c0_i32 : i32, i32
  }
  func.func @transform_3(%arg0: i32) -> (i32, i32, i32) {
    %c0_i32 = arith.constant 0 : i32
    %c0_i32_0 = arith.constant 0 : i32
    %c0_i32_1 = arith.constant 0 : i32
    return %arg0, %c0_i32, %c0_i32_0 : i32, i32, i32
  }
}

module attributes {stable_mosaic.version = 11 : i64} {
  func.func @_bn_lrelu_kernel(%arg0: i32, %arg1: memref<128x128xbf16, #tpu.memory_space<vmem>>, %arg2: memref<1x128xf32, #tpu.memory_space<vmem>>, %arg3: memref<1x128xf32, #tpu.memory_space<vmem>>, %arg4: memref<128x128xbf16, #tpu.memory_space<vmem>>) attributes {dimension_semantics = [#tpu.dimension_semantics<parallel>], iteration_bounds = array<i64: 1>, scalar_prefetch = 0 : i64, scratch_operands = 0 : i64, tpu.core_type = #tpu.core_type<tc>, window_params = [{transform_indices = @transform_0, window_bounds = array<i64: 128, 128>}, {pipeline_mode = #tpu.pipeline_mode<synchronous>, transform_indices = @transform_1, window_bounds = array<i64: 1, 128>}, {pipeline_mode = #tpu.pipeline_mode<synchronous>, transform_indices = @transform_2, window_bounds = array<i64: 1, 128>}, {transform_indices = @transform_3, window_bounds = array<i64: 128, 128>}]} {
    %c0 = arith.constant 0 : index
    %c0_0 = arith.constant 0 : index
    %0 = vector.load %arg1[%c0, %c0_0] : memref<128x128xbf16, #tpu.memory_space<vmem>>, vector<128x128xbf16>
    %1 = arith.extf %0 : vector<128x128xbf16> to vector<128x128xf32>
    %c0_1 = arith.constant 0 : index
    %c0_2 = arith.constant 0 : index
    %2 = vector.load %arg2[%c0_1, %c0_2] : memref<1x128xf32, #tpu.memory_space<vmem>>, vector<1x128xf32>
    %3 = vector.broadcast %2 : vector<1x128xf32> to vector<128x128xf32>
    %4 = arith.mulf %1, %3 : vector<128x128xf32>
    %c0_3 = arith.constant 0 : index
    %c0_4 = arith.constant 0 : index
    %5 = vector.load %arg3[%c0_3, %c0_4] : memref<1x128xf32, #tpu.memory_space<vmem>>, vector<1x128xf32>
    %6 = vector.broadcast %5 : vector<1x128xf32> to vector<128x128xf32>
    %7 = arith.addf %4, %6 : vector<128x128xf32>
    %cst = arith.constant 0.000000e+00 : f32
    %8 = vector.broadcast %cst : f32 to vector<128x128xf32>
    %9 = arith.cmpf ogt, %7, %8 : vector<128x128xf32>
    %cst_5 = arith.constant 2.000000e-01 : f32
    %10 = vector.broadcast %cst_5 : f32 to vector<128x128xf32>
    %11 = arith.mulf %10, %7 : vector<128x128xf32>
    %12 = arith.select %9, %7, %11 : vector<128x128xi1>, vector<128x128xf32>
    %13 = arith.truncf %12 : vector<128x128xf32> to vector<128x128xbf16>
    %c0_6 = arith.constant 0 : index
    %c0_7 = arith.constant 0 : index
    %14 = vector.load %arg4[%c0_6, %c0_7] : memref<128x128xbf16, #tpu.memory_space<vmem>>, vector<128x128xbf16>
    tpu.vector_store %arg4[%c0_6, %c0_7], %13 {strides = array<i32>} : memref<128x128xbf16, #tpu.memory_space<vmem>>, vector<128x128xbf16>,
    return
  }
  func.func @transform_0(%arg0: i32) -> (i32, i32) {
    %c0_i32 = arith.constant 0 : i32
    %c0_i32_0 = arith.constant 0 : i32
    return %arg0, %c0_i32 : i32, i32
  }
  func.func @transform_1(%arg0: i32) -> (i32, i32) {
    %c0_i32 = arith.constant 0 : i32
    %c0_i32_0 = arith.constant 0 : i32
    %c0_i32_1 = arith.constant 0 : i32
    return %c0_i32, %c0_i32_0 : i32, i32
  }
  func.func @transform_2(%arg0: i32) -> (i32, i32) {
    %c0_i32 = arith.constant 0 : i32
    %c0_i32_0 = arith.constant 0 : i32
    %c0_i32_1 = arith.constant 0 : i32
    return %c0_i32, %c0_i32_0 : i32, i32
  }
  func.func @transform_3(%arg0: i32) -> (i32, i32) {
    %c0_i32 = arith.constant 0 : i32
    %c0_i32_0 = arith.constant 0 : i32
    return %arg0, %c0_i32 : i32, i32
  }
}

module attributes {stable_mosaic.version = 11 : i64} {
  func.func @_conv_pair_stats_kernel(%arg0: i32, %arg1: memref<4x2x20x256xbf16, #tpu.memory_space<vmem>>, %arg2: memref<8x256x128xbf16, #tpu.memory_space<vmem>>, %arg3: memref<2x16x128xbf16, #tpu.memory_space<vmem>>, %arg4: memref<2x2x128xf32, #tpu.memory_space<vmem>>, %arg5: memref<16x128xf32, #tpu.memory_space<vmem>>) attributes {dimension_semantics = [#tpu.dimension_semantics<parallel>], iteration_bounds = array<i64: 1>, scalar_prefetch = 0 : i64, scratch_operands = 1 : i64, tpu.core_type = #tpu.core_type<tc>, window_params = [{transform_indices = @transform_0, window_bounds = array<i64: 4, 2, 20, 256>}, {pipeline_mode = #tpu.pipeline_mode<synchronous>, transform_indices = @transform_1, window_bounds = array<i64: 8, 256, 128>}, {transform_indices = @transform_2, window_bounds = array<i64: 2, 16, 128>}, {transform_indices = @transform_3, window_bounds = array<i64: 2, 2, 128>}]} {
    %c0 = arith.constant 0 : index
    %c0_0 = arith.constant 0 : index
    %c0_1 = arith.constant 0 : index
    %c0_2 = arith.constant 0 : index
    %0 = vector.load %arg1[%c0, %c0_0, %c0_1, %c0_2] : memref<4x2x20x256xbf16, #tpu.memory_space<vmem>>, vector<1x1x16x256xbf16>
    %1 = vector.shape_cast %0 : vector<1x1x16x256xbf16> to vector<16x256xbf16>
    %c0_3 = arith.constant 0 : index
    %c0_4 = arith.constant 0 : index
    %c0_5 = arith.constant 0 : index
    %2 = vector.load %arg2[%c0_3, %c0_4, %c0_5] : memref<8x256x128xbf16, #tpu.memory_space<vmem>>, vector<1x256x128xbf16>
    %3 = vector.shape_cast %2 : vector<1x256x128xbf16> to vector<256x128xbf16>
    %cst = arith.constant dense<0.000000e+00> : vector<16x128xf32>
    %4 = tpu.matmul %1, %3, %cst {dimension_numbers = #tpu.dot_dimension_numbers<[1], [0], [0], [1], [0, 0, 1, 1], [], []>} : vector<16x256xbf16>, vector<256x128xbf16>, vector<16x128xf32> -> vector<16x128xf32>
    %c0_6 = arith.constant 0 : index
    %c0_7 = arith.constant 0 : index
    %5 = vector.load %arg5[%c0_6, %c0_7] : memref<16x128xf32, #tpu.memory_space<vmem>>, vector<16x128xf32>
    tpu.vector_store %arg5[%c0_6, %c0_7], %4 {strides = array<i32>} : memref<16x128xf32, #tpu.memory_space<vmem>>, vector<16x128xf32>,
    %c1 = arith.constant 1 : index
    %c0_8 = arith.constant 0 : index
    %c0_9 = arith.constant 0 : index
    %c0_10 = arith.constant 0 : index
    %6 = vector.load %arg1[%c1, %c0_8, %c0_9, %c0_10] : memref<4x2x20x256xbf16, #tpu.memory_space<vmem>>, vector<1x1x16x256xbf16>
    %7 = vector.shape_cast %6 : vector<1x1x16x256xbf16> to vector<16x256xbf16>
    %c1_11 = arith.constant 1 : index
    %c0_12 = arith.constant 0 : index
    %c0_13 = arith.constant 0 : index
    %8 = vector.load %arg2[%c1_11, %c0_12, %c0_13] : memref<8x256x128xbf16, #tpu.memory_space<vmem>>, vector<1x256x128xbf16>
    %9 = vector.shape_cast %8 : vector<1x256x128xbf16> to vector<256x128xbf16>
    %cst_14 = arith.constant dense<0.000000e+00> : vector<16x128xf32>
    %10 = tpu.matmul %7, %9, %cst_14 {dimension_numbers = #tpu.dot_dimension_numbers<[1], [0], [0], [1], [0, 0, 1, 1], [], []>} : vector<16x256xbf16>, vector<256x128xbf16>, vector<16x128xf32> -> vector<16x128xf32>
    %c0_15 = arith.constant 0 : index
    %c0_16 = arith.constant 0 : index
    %11 = vector.load %arg5[%c0_15, %c0_16] : memref<16x128xf32, #tpu.memory_space<vmem>>, vector<16x128xf32>
    %12 = arith.addf %11, %10 : vector<16x128xf32>
    %c0_17 = arith.constant 0 : index
    %c0_18 = arith.constant 0 : index
    %13 = vector.load %arg5[%c0_17, %c0_18] : memref<16x128xf32, #tpu.memory_space<vmem>>, vector<16x128xf32>
    tpu.vector_store %arg5[%c0_17, %c0_18], %12 {strides = array<i32>} : memref<16x128xf32, #tpu.memory_space<vmem>>, vector<16x128xf32>,
    %c2 = arith.constant 2 : index
    %c0_19 = arith.constant 0 : index
    %c0_20 = arith.constant 0 : index
    %c0_21 = arith.constant 0 : index
    %14 = vector.load %arg1[%c2, %c0_19, %c0_20, %c0_21] : memref<4x2x20x256xbf16, #tpu.memory_space<vmem>>, vector<1x1x16x256xbf16>
    %15 = vector.shape_cast %14 : vector<1x1x16x256xbf16> to vector<16x256xbf16>
    %c2_22 = arith.constant 2 : index
    %c0_23 = arith.constant 0 : index
    %c0_24 = arith.constant 0 : index
    %16 = vector.load %arg2[%c2_22, %c0_23, %c0_24] : memref<8x256x128xbf16, #tpu.memory_space<vmem>>, vector<1x256x128xbf16>
    %17 = vector.shape_cast %16 : vector<1x256x128xbf16> to vector<256x128xbf16>
    %cst_25 = arith.constant dense<0.000000e+00> : vector<16x128xf32>
    %18 = tpu.matmul %15, %17, %cst_25 {dimension_numbers = #tpu.dot_dimension_numbers<[1], [0], [0], [1], [0, 0, 1, 1], [], []>} : vector<16x256xbf16>, vector<256x128xbf16>, vector<16x128xf32> -> vector<16x128xf32>
    %c0_26 = arith.constant 0 : index
    %c0_27 = arith.constant 0 : index
    %19 = vector.load %arg5[%c0_26, %c0_27] : memref<16x128xf32, #tpu.memory_space<vmem>>, vector<16x128xf32>
    %20 = arith.addf %19, %18 : vector<16x128xf32>
    %c0_28 = arith.constant 0 : index
    %c0_29 = arith.constant 0 : index
    %21 = vector.load %arg5[%c0_28, %c0_29] : memref<16x128xf32, #tpu.memory_space<vmem>>, vector<16x128xf32>
    tpu.vector_store %arg5[%c0_28, %c0_29], %20 {strides = array<i32>} : memref<16x128xf32, #tpu.memory_space<vmem>>, vector<16x128xf32>,
    %c3 = arith.constant 3 : index
    %c0_30 = arith.constant 0 : index
    %c0_31 = arith.constant 0 : index
    %c0_32 = arith.constant 0 : index
    %22 = vector.load %arg1[%c3, %c0_30, %c0_31, %c0_32] : memref<4x2x20x256xbf16, #tpu.memory_space<vmem>>, vector<1x1x16x256xbf16>
    %23 = vector.shape_cast %22 : vector<1x1x16x256xbf16> to vector<16x256xbf16>
    %c3_33 = arith.constant 3 : index
    %c0_34 = arith.constant 0 : index
    %c0_35 = arith.constant 0 : index
    %24 = vector.load %arg2[%c3_33, %c0_34, %c0_35] : memref<8x256x128xbf16, #tpu.memory_space<vmem>>, vector<1x256x128xbf16>
    %25 = vector.shape_cast %24 : vector<1x256x128xbf16> to vector<256x128xbf16>
    %cst_36 = arith.constant dense<0.000000e+00> : vector<16x128xf32>
    %26 = tpu.matmul %23, %25, %cst_36 {dimension_numbers = #tpu.dot_dimension_numbers<[1], [0], [0], [1], [0, 0, 1, 1], [], []>} : vector<16x256xbf16>, vector<256x128xbf16>, vector<16x128xf32> -> vector<16x128xf32>
    %c0_37 = arith.constant 0 : index
    %c0_38 = arith.constant 0 : index
    %27 = vector.load %arg5[%c0_37, %c0_38] : memref<16x128xf32, #tpu.memory_space<vmem>>, vector<16x128xf32>
    %28 = arith.addf %27, %26 : vector<16x128xf32>
    %c0_39 = arith.constant 0 : index
    %c0_40 = arith.constant 0 : index
    %29 = vector.load %arg5[%c0_39, %c0_40] : memref<16x128xf32, #tpu.memory_space<vmem>>, vector<16x128xf32>
    tpu.vector_store %arg5[%c0_39, %c0_40], %28 {strides = array<i32>} : memref<16x128xf32, #tpu.memory_space<vmem>>, vector<16x128xf32>,
    %c0_41 = arith.constant 0 : index
    %c0_42 = arith.constant 0 : index
    %c4 = arith.constant 4 : index
    %c0_43 = arith.constant 0 : index
    %30 = vector.load %arg1[%c0_41, %c0_42, %c4, %c0_43] : memref<4x2x20x256xbf16, #tpu.memory_space<vmem>>, vector<1x1x16x256xbf16>
    %31 = vector.shape_cast %30 : vector<1x1x16x256xbf16> to vector<16x256xbf16>
    %c4_44 = arith.constant 4 : index
    %c0_45 = arith.constant 0 : index
    %c0_46 = arith.constant 0 : index
    %32 = vector.load %arg2[%c4_44, %c0_45, %c0_46] : memref<8x256x128xbf16, #tpu.memory_space<vmem>>, vector<1x256x128xbf16>
    %33 = vector.shape_cast %32 : vector<1x256x128xbf16> to vector<256x128xbf16>
    %cst_47 = arith.constant dense<0.000000e+00> : vector<16x128xf32>
    %34 = tpu.matmul %31, %33, %cst_47 {dimension_numbers = #tpu.dot_dimension_numbers<[1], [0], [0], [1], [0, 0, 1, 1], [], []>} : vector<16x256xbf16>, vector<256x128xbf16>, vector<16x128xf32> -> vector<16x128xf32>
    %c0_48 = arith.constant 0 : index
    %c0_49 = arith.constant 0 : index
    %35 = vector.load %arg5[%c0_48, %c0_49] : memref<16x128xf32, #tpu.memory_space<vmem>>, vector<16x128xf32>
    %36 = arith.addf %35, %34 : vector<16x128xf32>
    %c0_50 = arith.constant 0 : index
    %c0_51 = arith.constant 0 : index
    %37 = vector.load %arg5[%c0_50, %c0_51] : memref<16x128xf32, #tpu.memory_space<vmem>>, vector<16x128xf32>
    tpu.vector_store %arg5[%c0_50, %c0_51], %36 {strides = array<i32>} : memref<16x128xf32, #tpu.memory_space<vmem>>, vector<16x128xf32>,
    %c1_52 = arith.constant 1 : index
    %c0_53 = arith.constant 0 : index
    %c4_54 = arith.constant 4 : index
    %c0_55 = arith.constant 0 : index
    %38 = vector.load %arg1[%c1_52, %c0_53, %c4_54, %c0_55] : memref<4x2x20x256xbf16, #tpu.memory_space<vmem>>, vector<1x1x16x256xbf16>
    %39 = vector.shape_cast %38 : vector<1x1x16x256xbf16> to vector<16x256xbf16>
    %c5 = arith.constant 5 : index
    %c0_56 = arith.constant 0 : index
    %c0_57 = arith.constant 0 : index
    %40 = vector.load %arg2[%c5, %c0_56, %c0_57] : memref<8x256x128xbf16, #tpu.memory_space<vmem>>, vector<1x256x128xbf16>
    %41 = vector.shape_cast %40 : vector<1x256x128xbf16> to vector<256x128xbf16>
    %cst_58 = arith.constant dense<0.000000e+00> : vector<16x128xf32>
    %42 = tpu.matmul %39, %41, %cst_58 {dimension_numbers = #tpu.dot_dimension_numbers<[1], [0], [0], [1], [0, 0, 1, 1], [], []>} : vector<16x256xbf16>, vector<256x128xbf16>, vector<16x128xf32> -> vector<16x128xf32>
    %c0_59 = arith.constant 0 : index
    %c0_60 = arith.constant 0 : index
    %43 = vector.load %arg5[%c0_59, %c0_60] : memref<16x128xf32, #tpu.memory_space<vmem>>, vector<16x128xf32>
    %44 = arith.addf %43, %42 : vector<16x128xf32>
    %c0_61 = arith.constant 0 : index
    %c0_62 = arith.constant 0 : index
    %45 = vector.load %arg5[%c0_61, %c0_62] : memref<16x128xf32, #tpu.memory_space<vmem>>, vector<16x128xf32>
    tpu.vector_store %arg5[%c0_61, %c0_62], %44 {strides = array<i32>} : memref<16x128xf32, #tpu.memory_space<vmem>>, vector<16x128xf32>,
    %c2_63 = arith.constant 2 : index
    %c0_64 = arith.constant 0 : index
    %c4_65 = arith.constant 4 : index
    %c0_66 = arith.constant 0 : index
    %46 = vector.load %arg1[%c2_63, %c0_64, %c4_65, %c0_66] : memref<4x2x20x256xbf16, #tpu.memory_space<vmem>>, vector<1x1x16x256xbf16>
    %47 = vector.shape_cast %46 : vector<1x1x16x256xbf16> to vector<16x256xbf16>
    %c6 = arith.constant 6 : index
    %c0_67 = arith.constant 0 : index
    %c0_68 = arith.constant 0 : index
    %48 = vector.load %arg2[%c6, %c0_67, %c0_68] : memref<8x256x128xbf16, #tpu.memory_space<vmem>>, vector<1x256x128xbf16>
    %49 = vector.shape_cast %48 : vector<1x256x128xbf16> to vector<256x128xbf16>
    %cst_69 = arith.constant dense<0.000000e+00> : vector<16x128xf32>
    %50 = tpu.matmul %47, %49, %cst_69 {dimension_numbers = #tpu.dot_dimension_numbers<[1], [0], [0], [1], [0, 0, 1, 1], [], []>} : vector<16x256xbf16>, vector<256x128xbf16>, vector<16x128xf32> -> vector<16x128xf32>
    %c0_70 = arith.constant 0 : index
    %c0_71 = arith.constant 0 : index
    %51 = vector.load %arg5[%c0_70, %c0_71] : memref<16x128xf32, #tpu.memory_space<vmem>>, vector<16x128xf32>
    %52 = arith.addf %51, %50 : vector<16x128xf32>
    %c0_72 = arith.constant 0 : index
    %c0_73 = arith.constant 0 : index
    %53 = vector.load %arg5[%c0_72, %c0_73] : memref<16x128xf32, #tpu.memory_space<vmem>>, vector<16x128xf32>
    tpu.vector_store %arg5[%c0_72, %c0_73], %52 {strides = array<i32>} : memref<16x128xf32, #tpu.memory_space<vmem>>, vector<16x128xf32>,
    %c3_74 = arith.constant 3 : index
    %c0_75 = arith.constant 0 : index
    %c4_76 = arith.constant 4 : index
    %c0_77 = arith.constant 0 : index
    %54 = vector.load %arg1[%c3_74, %c0_75, %c4_76, %c0_77] : memref<4x2x20x256xbf16, #tpu.memory_space<vmem>>, vector<1x1x16x256xbf16>
    %55 = vector.shape_cast %54 : vector<1x1x16x256xbf16> to vector<16x256xbf16>
    %c7 = arith.constant 7 : index
    %c0_78 = arith.constant 0 : index
    %c0_79 = arith.constant 0 : index
    %56 = vector.load %arg2[%c7, %c0_78, %c0_79] : memref<8x256x128xbf16, #tpu.memory_space<vmem>>, vector<1x256x128xbf16>
    %57 = vector.shape_cast %56 : vector<1x256x128xbf16> to vector<256x128xbf16>
    %cst_80 = arith.constant dense<0.000000e+00> : vector<16x128xf32>
    %58 = tpu.matmul %55, %57, %cst_80 {dimension_numbers = #tpu.dot_dimension_numbers<[1], [0], [0], [1], [0, 0, 1, 1], [], []>} : vector<16x256xbf16>, vector<256x128xbf16>, vector<16x128xf32> -> vector<16x128xf32>
    %c0_81 = arith.constant 0 : index
    %c0_82 = arith.constant 0 : index
    %59 = vector.load %arg5[%c0_81, %c0_82] : memref<16x128xf32, #tpu.memory_space<vmem>>, vector<16x128xf32>
    %60 = arith.addf %59, %58 : vector<16x128xf32>
    %c0_83 = arith.constant 0 : index
    %c0_84 = arith.constant 0 : index
    %61 = vector.load %arg5[%c0_83, %c0_84] : memref<16x128xf32, #tpu.memory_space<vmem>>, vector<16x128xf32>
    tpu.vector_store %arg5[%c0_83, %c0_84], %60 {strides = array<i32>} : memref<16x128xf32, #tpu.memory_space<vmem>>, vector<16x128xf32>,
    %c0_85 = arith.constant 0 : index
    %c0_86 = arith.constant 0 : index
    %62 = vector.load %arg5[%c0_85, %c0_86] : memref<16x128xf32, #tpu.memory_space<vmem>>, vector<16x128xf32>
    %63 = arith.truncf %62 : vector<16x128xf32> to vector<16x128xbf16>
    %c0_87 = arith.constant 0 : index
    %c0_88 = arith.constant 0 : index
    %c0_89 = arith.constant 0 : index
    %64 = vector.load %arg3[%c0_87, %c0_88, %c0_89] : memref<2x16x128xbf16, #tpu.memory_space<vmem>>, vector<1x16x128xbf16>
    %65 = vector.shape_cast %64 : vector<1x16x128xbf16> to vector<16x128xbf16>
    %66 = vector.shape_cast %63 : vector<16x128xbf16> to vector<1x16x128xbf16>
    tpu.vector_store %arg3[%c0_87, %c0_88, %c0_89], %66 {strides = array<i32>} : memref<2x16x128xbf16, #tpu.memory_space<vmem>>, vector<1x16x128xbf16>,
    %cst_90 = arith.constant dense<0.000000e+00> : vector<128xf32>
    %67 = vector.multi_reduction <add>, %62, %cst_90 [0] : vector<16x128xf32> to vector<128xf32>
    %68 = vector.shape_cast %67 : vector<128xf32> to vector<1x128xf32>
    %cst_91 = arith.constant 6.250000e-02 : f32
    %69 = vector.broadcast %cst_91 : f32 to vector<1x128xf32>
    %70 = arith.mulf %68, %69 : vector<1x128xf32>
    %71 = vector.broadcast %70 : vector<1x128xf32> to vector<16x128xf32>
    %72 = arith.subf %62, %71 : vector<16x128xf32>
    %c0_92 = arith.constant 0 : index
    %c0_93 = arith.constant 0 : index
    %c0_94 = arith.constant 0 : index
    %73 = vector.load %arg4[%c0_92, %c0_93, %c0_94] : memref<2x2x128xf32, #tpu.memory_space<vmem>>, vector<1x1x128xf32>
    %74 = vector.shape_cast %73 : vector<1x1x128xf32> to vector<1x128xf32>
    %75 = vector.shape_cast %68 : vector<1x128xf32> to vector<1x1x128xf32>
    tpu.vector_store %arg4[%c0_92, %c0_93, %c0_94], %75 {strides = array<i32>} : memref<2x2x128xf32, #tpu.memory_space<vmem>>, vector<1x1x128xf32>,
    %76 = arith.mulf %72, %72 : vector<16x128xf32>
    %cst_95 = arith.constant dense<0.000000e+00> : vector<128xf32>
    %77 = vector.multi_reduction <add>, %76, %cst_95 [0] : vector<16x128xf32> to vector<128xf32>
    %78 = vector.shape_cast %77 : vector<128xf32> to vector<1x128xf32>
    %c0_96 = arith.constant 0 : index
    %c1_97 = arith.constant 1 : index
    %c0_98 = arith.constant 0 : index
    %79 = vector.load %arg4[%c0_96, %c1_97, %c0_98] : memref<2x2x128xf32, #tpu.memory_space<vmem>>, vector<1x1x128xf32>
    %80 = vector.shape_cast %79 : vector<1x1x128xf32> to vector<1x128xf32>
    %81 = vector.shape_cast %78 : vector<1x128xf32> to vector<1x1x128xf32>
    tpu.vector_store %arg4[%c0_96, %c1_97, %c0_98], %81 {strides = array<i32>} : memref<2x2x128xf32, #tpu.memory_space<vmem>>, vector<1x1x128xf32>,
    %c0_99 = arith.constant 0 : index
    %c1_100 = arith.constant 1 : index
    %c0_101 = arith.constant 0 : index
    %c0_102 = arith.constant 0 : index
    %82 = vector.load %arg1[%c0_99, %c1_100, %c0_101, %c0_102] : memref<4x2x20x256xbf16, #tpu.memory_space<vmem>>, vector<1x1x16x256xbf16>
    %83 = vector.shape_cast %82 : vector<1x1x16x256xbf16> to vector<16x256xbf16>
    %c0_103 = arith.constant 0 : index
    %c0_104 = arith.constant 0 : index
    %c0_105 = arith.constant 0 : index
    %84 = vector.load %arg2[%c0_103, %c0_104, %c0_105] : memref<8x256x128xbf16, #tpu.memory_space<vmem>>, vector<1x256x128xbf16>
    %85 = vector.shape_cast %84 : vector<1x256x128xbf16> to vector<256x128xbf16>
    %cst_106 = arith.constant dense<0.000000e+00> : vector<16x128xf32>
    %86 = tpu.matmul %83, %85, %cst_106 {dimension_numbers = #tpu.dot_dimension_numbers<[1], [0], [0], [1], [0, 0, 1, 1], [], []>} : vector<16x256xbf16>, vector<256x128xbf16>, vector<16x128xf32> -> vector<16x128xf32>
    %c0_107 = arith.constant 0 : index
    %c0_108 = arith.constant 0 : index
    %87 = vector.load %arg5[%c0_107, %c0_108] : memref<16x128xf32, #tpu.memory_space<vmem>>, vector<16x128xf32>
    tpu.vector_store %arg5[%c0_107, %c0_108], %86 {strides = array<i32>} : memref<16x128xf32, #tpu.memory_space<vmem>>, vector<16x128xf32>,
    %c1_109 = arith.constant 1 : index
    %c1_110 = arith.constant 1 : index
    %c0_111 = arith.constant 0 : index
    %c0_112 = arith.constant 0 : index
    %88 = vector.load %arg1[%c1_109, %c1_110, %c0_111, %c0_112] : memref<4x2x20x256xbf16, #tpu.memory_space<vmem>>, vector<1x1x16x256xbf16>
    %89 = vector.shape_cast %88 : vector<1x1x16x256xbf16> to vector<16x256xbf16>
    %c1_113 = arith.constant 1 : index
    %c0_114 = arith.constant 0 : index
    %c0_115 = arith.constant 0 : index
    %90 = vector.load %arg2[%c1_113, %c0_114, %c0_115] : memref<8x256x128xbf16, #tpu.memory_space<vmem>>, vector<1x256x128xbf16>
    %91 = vector.shape_cast %90 : vector<1x256x128xbf16> to vector<256x128xbf16>
    %cst_116 = arith.constant dense<0.000000e+00> : vector<16x128xf32>
    %92 = tpu.matmul %89, %91, %cst_116 {dimension_numbers = #tpu.dot_dimension_numbers<[1], [0], [0], [1], [0, 0, 1, 1], [], []>} : vector<16x256xbf16>, vector<256x128xbf16>, vector<16x128xf32> -> vector<16x128xf32>
    %c0_117 = arith.constant 0 : index
    %c0_118 = arith.constant 0 : index
    %93 = vector.load %arg5[%c0_117, %c0_118] : memref<16x128xf32, #tpu.memory_space<vmem>>, vector<16x128xf32>
    %94 = arith.addf %93, %92 : vector<16x128xf32>
    %c0_119 = arith.constant 0 : index
    %c0_120 = arith.constant 0 : index
    %95 = vector.load %arg5[%c0_119, %c0_120] : memref<16x128xf32, #tpu.memory_space<vmem>>, vector<16x128xf32>
    tpu.vector_store %arg5[%c0_119, %c0_120], %94 {strides = array<i32>} : memref<16x128xf32, #tpu.memory_space<vmem>>, vector<16x128xf32>,
    %c2_121 = arith.constant 2 : index
    %c1_122 = arith.constant 1 : index
    %c0_123 = arith.constant 0 : index
    %c0_124 = arith.constant 0 : index
    %96 = vector.load %arg1[%c2_121, %c1_122, %c0_123, %c0_124] : memref<4x2x20x256xbf16, #tpu.memory_space<vmem>>, vector<1x1x16x256xbf16>
    %97 = vector.shape_cast %96 : vector<1x1x16x256xbf16> to vector<16x256xbf16>
    %c2_125 = arith.constant 2 : index
    %c0_126 = arith.constant 0 : index
    %c0_127 = arith.constant 0 : index
    %98 = vector.load %arg2[%c2_125, %c0_126, %c0_127] : memref<8x256x128xbf16, #tpu.memory_space<vmem>>, vector<1x256x128xbf16>
    %99 = vector.shape_cast %98 : vector<1x256x128xbf16> to vector<256x128xbf16>
    %cst_128 = arith.constant dense<0.000000e+00> : vector<16x128xf32>
    %100 = tpu.matmul %97, %99, %cst_128 {dimension_numbers = #tpu.dot_dimension_numbers<[1], [0], [0], [1], [0, 0, 1, 1], [], []>} : vector<16x256xbf16>, vector<256x128xbf16>, vector<16x128xf32> -> vector<16x128xf32>
    %c0_129 = arith.constant 0 : index
    %c0_130 = arith.constant 0 : index
    %101 = vector.load %arg5[%c0_129, %c0_130] : memref<16x128xf32, #tpu.memory_space<vmem>>, vector<16x128xf32>
    %102 = arith.addf %101, %100 : vector<16x128xf32>
    %c0_131 = arith.constant 0 : index
    %c0_132 = arith.constant 0 : index
    %103 = vector.load %arg5[%c0_131, %c0_132] : memref<16x128xf32, #tpu.memory_space<vmem>>, vector<16x128xf32>
    tpu.vector_store %arg5[%c0_131, %c0_132], %102 {strides = array<i32>} : memref<16x128xf32, #tpu.memory_space<vmem>>, vector<16x128xf32>,
    %c3_133 = arith.constant 3 : index
    %c1_134 = arith.constant 1 : index
    %c0_135 = arith.constant 0 : index
    %c0_136 = arith.constant 0 : index
    %104 = vector.load %arg1[%c3_133, %c1_134, %c0_135, %c0_136] : memref<4x2x20x256xbf16, #tpu.memory_space<vmem>>, vector<1x1x16x256xbf16>
    %105 = vector.shape_cast %104 : vector<1x1x16x256xbf16> to vector<16x256xbf16>
    %c3_137 = arith.constant 3 : index
    %c0_138 = arith.constant 0 : index
    %c0_139 = arith.constant 0 : index
    %106 = vector.load %arg2[%c3_137, %c0_138, %c0_139] : memref<8x256x128xbf16, #tpu.memory_space<vmem>>, vector<1x256x128xbf16>
    %107 = vector.shape_cast %106 : vector<1x256x128xbf16> to vector<256x128xbf16>
    %cst_140 = arith.constant dense<0.000000e+00> : vector<16x128xf32>
    %108 = tpu.matmul %105, %107, %cst_140 {dimension_numbers = #tpu.dot_dimension_numbers<[1], [0], [0], [1], [0, 0, 1, 1], [], []>} : vector<16x256xbf16>, vector<256x128xbf16>, vector<16x128xf32> -> vector<16x128xf32>
    %c0_141 = arith.constant 0 : index
    %c0_142 = arith.constant 0 : index
    %109 = vector.load %arg5[%c0_141, %c0_142] : memref<16x128xf32, #tpu.memory_space<vmem>>, vector<16x128xf32>
    %110 = arith.addf %109, %108 : vector<16x128xf32>
    %c0_143 = arith.constant 0 : index
    %c0_144 = arith.constant 0 : index
    %111 = vector.load %arg5[%c0_143, %c0_144] : memref<16x128xf32, #tpu.memory_space<vmem>>, vector<16x128xf32>
    tpu.vector_store %arg5[%c0_143, %c0_144], %110 {strides = array<i32>} : memref<16x128xf32, #tpu.memory_space<vmem>>, vector<16x128xf32>,
    %c0_145 = arith.constant 0 : index
    %c1_146 = arith.constant 1 : index
    %c4_147 = arith.constant 4 : index
    %c0_148 = arith.constant 0 : index
    %112 = vector.load %arg1[%c0_145, %c1_146, %c4_147, %c0_148] : memref<4x2x20x256xbf16, #tpu.memory_space<vmem>>, vector<1x1x16x256xbf16>
    %113 = vector.shape_cast %112 : vector<1x1x16x256xbf16> to vector<16x256xbf16>
    %c4_149 = arith.constant 4 : index
    %c0_150 = arith.constant 0 : index
    %c0_151 = arith.constant 0 : index
    %114 = vector.load %arg2[%c4_149, %c0_150, %c0_151] : memref<8x256x128xbf16, #tpu.memory_space<vmem>>, vector<1x256x128xbf16>
    %115 = vector.shape_cast %114 : vector<1x256x128xbf16> to vector<256x128xbf16>
    %cst_152 = arith.constant dense<0.000000e+00> : vector<16x128xf32>
    %116 = tpu.matmul %113, %115, %cst_152 {dimension_numbers = #tpu.dot_dimension_numbers<[1], [0], [0], [1], [0, 0, 1, 1], [], []>} : vector<16x256xbf16>, vector<256x128xbf16>, vector<16x128xf32> -> vector<16x128xf32>
    %c0_153 = arith.constant 0 : index
    %c0_154 = arith.constant 0 : index
    %117 = vector.load %arg5[%c0_153, %c0_154] : memref<16x128xf32, #tpu.memory_space<vmem>>, vector<16x128xf32>
    %118 = arith.addf %117, %116 : vector<16x128xf32>
    %c0_155 = arith.constant 0 : index
    %c0_156 = arith.constant 0 : index
    %119 = vector.load %arg5[%c0_155, %c0_156] : memref<16x128xf32, #tpu.memory_space<vmem>>, vector<16x128xf32>
    tpu.vector_store %arg5[%c0_155, %c0_156], %118 {strides = array<i32>} : memref<16x128xf32, #tpu.memory_space<vmem>>, vector<16x128xf32>,
    %c1_157 = arith.constant 1 : index
    %c1_158 = arith.constant 1 : index
    %c4_159 = arith.constant 4 : index
    %c0_160 = arith.constant 0 : index
    %120 = vector.load %arg1[%c1_157, %c1_158, %c4_159, %c0_160] : memref<4x2x20x256xbf16, #tpu.memory_space<vmem>>, vector<1x1x16x256xbf16>
    %121 = vector.shape_cast %120 : vector<1x1x16x256xbf16> to vector<16x256xbf16>
    %c5_161 = arith.constant 5 : index
    %c0_162 = arith.constant 0 : index
    %c0_163 = arith.constant 0 : index
    %122 = vector.load %arg2[%c5_161, %c0_162, %c0_163] : memref<8x256x128xbf16, #tpu.memory_space<vmem>>, vector<1x256x128xbf16>
    %123 = vector.shape_cast %122 : vector<1x256x128xbf16> to vector<256x128xbf16>
    %cst_164 = arith.constant dense<0.000000e+00> : vector<16x128xf32>
    %124 = tpu.matmul %121, %123, %cst_164 {dimension_numbers = #tpu.dot_dimension_numbers<[1], [0], [0], [1], [0, 0, 1, 1], [], []>} : vector<16x256xbf16>, vector<256x128xbf16>, vector<16x128xf32> -> vector<16x128xf32>
    %c0_165 = arith.constant 0 : index
    %c0_166 = arith.constant 0 : index
    %125 = vector.load %arg5[%c0_165, %c0_166] : memref<16x128xf32, #tpu.memory_space<vmem>>, vector<16x128xf32>
    %126 = arith.addf %125, %124 : vector<16x128xf32>
    %c0_167 = arith.constant 0 : index
    %c0_168 = arith.constant 0 : index
    %127 = vector.load %arg5[%c0_167, %c0_168] : memref<16x128xf32, #tpu.memory_space<vmem>>, vector<16x128xf32>
    tpu.vector_store %arg5[%c0_167, %c0_168], %126 {strides = array<i32>} : memref<16x128xf32, #tpu.memory_space<vmem>>, vector<16x128xf32>,
    %c2_169 = arith.constant 2 : index
    %c1_170 = arith.constant 1 : index
    %c4_171 = arith.constant 4 : index
    %c0_172 = arith.constant 0 : index
    %128 = vector.load %arg1[%c2_169, %c1_170, %c4_171, %c0_172] : memref<4x2x20x256xbf16, #tpu.memory_space<vmem>>, vector<1x1x16x256xbf16>
    %129 = vector.shape_cast %128 : vector<1x1x16x256xbf16> to vector<16x256xbf16>
    %c6_173 = arith.constant 6 : index
    %c0_174 = arith.constant 0 : index
    %c0_175 = arith.constant 0 : index
    %130 = vector.load %arg2[%c6_173, %c0_174, %c0_175] : memref<8x256x128xbf16, #tpu.memory_space<vmem>>, vector<1x256x128xbf16>
    %131 = vector.shape_cast %130 : vector<1x256x128xbf16> to vector<256x128xbf16>
    %cst_176 = arith.constant dense<0.000000e+00> : vector<16x128xf32>
    %132 = tpu.matmul %129, %131, %cst_176 {dimension_numbers = #tpu.dot_dimension_numbers<[1], [0], [0], [1], [0, 0, 1, 1], [], []>} : vector<16x256xbf16>, vector<256x128xbf16>, vector<16x128xf32> -> vector<16x128xf32>
    %c0_177 = arith.constant 0 : index
    %c0_178 = arith.constant 0 : index
    %133 = vector.load %arg5[%c0_177, %c0_178] : memref<16x128xf32, #tpu.memory_space<vmem>>, vector<16x128xf32>
    %134 = arith.addf %133, %132 : vector<16x128xf32>
    %c0_179 = arith.constant 0 : index
    %c0_180 = arith.constant 0 : index
    %135 = vector.load %arg5[%c0_179, %c0_180] : memref<16x128xf32, #tpu.memory_space<vmem>>, vector<16x128xf32>
    tpu.vector_store %arg5[%c0_179, %c0_180], %134 {strides = array<i32>} : memref<16x128xf32, #tpu.memory_space<vmem>>, vector<16x128xf32>,
    %c3_181 = arith.constant 3 : index
    %c1_182 = arith.constant 1 : index
    %c4_183 = arith.constant 4 : index
    %c0_184 = arith.constant 0 : index
    %136 = vector.load %arg1[%c3_181, %c1_182, %c4_183, %c0_184] : memref<4x2x20x256xbf16, #tpu.memory_space<vmem>>, vector<1x1x16x256xbf16>
    %137 = vector.shape_cast %136 : vector<1x1x16x256xbf16> to vector<16x256xbf16>
    %c7_185 = arith.constant 7 : index
    %c0_186 = arith.constant 0 : index
    %c0_187 = arith.constant 0 : index
    %138 = vector.load %arg2[%c7_185, %c0_186, %c0_187] : memref<8x256x128xbf16, #tpu.memory_space<vmem>>, vector<1x256x128xbf16>
    %139 = vector.shape_cast %138 : vector<1x256x128xbf16> to vector<256x128xbf16>
    %cst_188 = arith.constant dense<0.000000e+00> : vector<16x128xf32>
    %140 = tpu.matmul %137, %139, %cst_188 {dimension_numbers = #tpu.dot_dimension_numbers<[1], [0], [0], [1], [0, 0, 1, 1], [], []>} : vector<16x256xbf16>, vector<256x128xbf16>, vector<16x128xf32> -> vector<16x128xf32>
    %c0_189 = arith.constant 0 : index
    %c0_190 = arith.constant 0 : index
    %141 = vector.load %arg5[%c0_189, %c0_190] : memref<16x128xf32, #tpu.memory_space<vmem>>, vector<16x128xf32>
    %142 = arith.addf %141, %140 : vector<16x128xf32>
    %c0_191 = arith.constant 0 : index
    %c0_192 = arith.constant 0 : index
    %143 = vector.load %arg5[%c0_191, %c0_192] : memref<16x128xf32, #tpu.memory_space<vmem>>, vector<16x128xf32>
    tpu.vector_store %arg5[%c0_191, %c0_192], %142 {strides = array<i32>} : memref<16x128xf32, #tpu.memory_space<vmem>>, vector<16x128xf32>,
    %c0_193 = arith.constant 0 : index
    %c0_194 = arith.constant 0 : index
    %144 = vector.load %arg5[%c0_193, %c0_194] : memref<16x128xf32, #tpu.memory_space<vmem>>, vector<16x128xf32>
    %145 = arith.truncf %144 : vector<16x128xf32> to vector<16x128xbf16>
    %c1_195 = arith.constant 1 : index
    %c0_196 = arith.constant 0 : index
    %c0_197 = arith.constant 0 : index
    %146 = vector.load %arg3[%c1_195, %c0_196, %c0_197] : memref<2x16x128xbf16, #tpu.memory_space<vmem>>, vector<1x16x128xbf16>
    %147 = vector.shape_cast %146 : vector<1x16x128xbf16> to vector<16x128xbf16>
    %148 = vector.shape_cast %145 : vector<16x128xbf16> to vector<1x16x128xbf16>
    tpu.vector_store %arg3[%c1_195, %c0_196, %c0_197], %148 {strides = array<i32>} : memref<2x16x128xbf16, #tpu.memory_space<vmem>>, vector<1x16x128xbf16>,
    %cst_198 = arith.constant dense<0.000000e+00> : vector<128xf32>
    %149 = vector.multi_reduction <add>, %144, %cst_198 [0] : vector<16x128xf32> to vector<128xf32>
    %150 = vector.shape_cast %149 : vector<128xf32> to vector<1x128xf32>
    %cst_199 = arith.constant 6.250000e-02 : f32
    %151 = vector.broadcast %cst_199 : f32 to vector<1x128xf32>
    %152 = arith.mulf %150, %151 : vector<1x128xf32>
    %153 = vector.broadcast %152 : vector<1x128xf32> to vector<16x128xf32>
    %154 = arith.subf %144, %153 : vector<16x128xf32>
    %c1_200 = arith.constant 1 : index
    %c0_201 = arith.constant 0 : index
    %c0_202 = arith.constant 0 : index
    %155 = vector.load %arg4[%c1_200, %c0_201, %c0_202] : memref<2x2x128xf32, #tpu.memory_space<vmem>>, vector<1x1x128xf32>
    %156 = vector.shape_cast %155 : vector<1x1x128xf32> to vector<1x128xf32>
    %157 = vector.shape_cast %150 : vector<1x128xf32> to vector<1x1x128xf32>
    tpu.vector_store %arg4[%c1_200, %c0_201, %c0_202], %157 {strides = array<i32>} : memref<2x2x128xf32, #tpu.memory_space<vmem>>, vector<1x1x128xf32>,
    %158 = arith.mulf %154, %154 : vector<16x128xf32>
    %cst_203 = arith.constant dense<0.000000e+00> : vector<128xf32>
    %159 = vector.multi_reduction <add>, %158, %cst_203 [0] : vector<16x128xf32> to vector<128xf32>
    %160 = vector.shape_cast %159 : vector<128xf32> to vector<1x128xf32>
    %c1_204 = arith.constant 1 : index
    %c1_205 = arith.constant 1 : index
    %c0_206 = arith.constant 0 : index
    %161 = vector.load %arg4[%c1_204, %c1_205, %c0_206] : memref<2x2x128xf32, #tpu.memory_space<vmem>>, vector<1x1x128xf32>
    %162 = vector.shape_cast %161 : vector<1x1x128xf32> to vector<1x128xf32>
    %163 = vector.shape_cast %160 : vector<1x128xf32> to vector<1x1x128xf32>
    tpu.vector_store %arg4[%c1_204, %c1_205, %c0_206], %163 {strides = array<i32>} : memref<2x2x128xf32, #tpu.memory_space<vmem>>, vector<1x1x128xf32>,
    return
  }
  func.func @transform_0(%arg0: i32) -> (i32, i32, i32, i32) {
    %c0_i32 = arith.constant 0 : i32
    %c0_i32_0 = arith.constant 0 : i32
    %c0_i32_1 = arith.constant 0 : i32
    %c0_i32_2 = arith.constant 0 : i32
    return %c0_i32, %arg0, %c0_i32_0, %c0_i32_1 : i32, i32, i32, i32
  }
  func.func @transform_1(%arg0: i32) -> (i32, i32, i32) {
    %c0_i32 = arith.constant 0 : i32
    %c0_i32_0 = arith.constant 0 : i32
    %c0_i32_1 = arith.constant 0 : i32
    %c0_i32_2 = arith.constant 0 : i32
    return %c0_i32, %c0_i32_0, %c0_i32_1 : i32, i32, i32
  }
  func.func @transform_2(%arg0: i32) -> (i32, i32, i32) {
    %c0_i32 = arith.constant 0 : i32
    %c0_i32_0 = arith.constant 0 : i32
    %c0_i32_1 = arith.constant 0 : i32
    return %arg0, %c0_i32, %c0_i32_0 : i32, i32, i32
  }
  func.func @transform_3(%arg0: i32) -> (i32, i32, i32) {
    %c0_i32 = arith.constant 0 : i32
    %c0_i32_0 = arith.constant 0 : i32
    %c0_i32_1 = arith.constant 0 : i32
    return %arg0, %c0_i32, %c0_i32_0 : i32, i32, i32
  }
}

module attributes {stable_mosaic.version = 11 : i64} {
  func.func @_bn_lrelu_head_kernel(%arg0: i32, %arg1: memref<2x16x128xbf16, #tpu.memory_space<vmem>>, %arg2: memref<1x128xf32, #tpu.memory_space<vmem>>, %arg3: memref<1x128xf32, #tpu.memory_space<vmem>>, %arg4: memref<16x128xf32, #tpu.memory_space<vmem>>, %arg5: memref<2x128xf32, #tpu.memory_space<vmem>>) attributes {dimension_semantics = [#tpu.dimension_semantics<arbitrary>], iteration_bounds = array<i64: 1>, scalar_prefetch = 0 : i64, scratch_operands = 0 : i64, tpu.core_type = #tpu.core_type<tc>, window_params = [{pipeline_mode = #tpu.pipeline_mode<synchronous>, transform_indices = @transform_0, window_bounds = array<i64: 2, 16, 128>}, {pipeline_mode = #tpu.pipeline_mode<synchronous>, transform_indices = @transform_1, window_bounds = array<i64: 1, 128>}, {pipeline_mode = #tpu.pipeline_mode<synchronous>, transform_indices = @transform_2, window_bounds = array<i64: 1, 128>}, {pipeline_mode = #tpu.pipeline_mode<synchronous>, transform_indices = @transform_3, window_bounds = array<i64: 16, 128>}, {pipeline_mode = #tpu.pipeline_mode<synchronous>, transform_indices = @transform_4, window_bounds = array<i64: 2, 128>}]} {
    %c0 = arith.constant 0 : index
    %c0_0 = arith.constant 0 : index
    %c0_1 = arith.constant 0 : index
    %0 = vector.load %arg1[%c0, %c0_0, %c0_1] : memref<2x16x128xbf16, #tpu.memory_space<vmem>>, vector<2x16x128xbf16>
    %1 = arith.extf %0 : vector<2x16x128xbf16> to vector<2x16x128xf32>
    %c0_2 = arith.constant 0 : index
    %c0_3 = arith.constant 0 : index
    %2 = vector.load %arg2[%c0_2, %c0_3] : memref<1x128xf32, #tpu.memory_space<vmem>>, vector<1x128xf32>
    %3 = vector.shape_cast %2 : vector<1x128xf32> to vector<1x1x128xf32>
    %4 = vector.broadcast %3 : vector<1x1x128xf32> to vector<2x16x128xf32>
    %5 = arith.mulf %1, %4 : vector<2x16x128xf32>
    %c0_4 = arith.constant 0 : index
    %c0_5 = arith.constant 0 : index
    %6 = vector.load %arg3[%c0_4, %c0_5] : memref<1x128xf32, #tpu.memory_space<vmem>>, vector<1x128xf32>
    %7 = vector.shape_cast %6 : vector<1x128xf32> to vector<1x1x128xf32>
    %8 = vector.broadcast %7 : vector<1x1x128xf32> to vector<2x16x128xf32>
    %9 = arith.addf %5, %8 : vector<2x16x128xf32>
    %cst = arith.constant 0.000000e+00 : f32
    %10 = vector.broadcast %cst : f32 to vector<2x16x128xf32>
    %11 = arith.cmpf ogt, %9, %10 : vector<2x16x128xf32>
    %cst_6 = arith.constant 2.000000e-01 : f32
    %12 = vector.broadcast %cst_6 : f32 to vector<2x16x128xf32>
    %13 = arith.mulf %12, %9 : vector<2x16x128xf32>
    %14 = arith.select %11, %9, %13 : vector<2x16x128xi1>, vector<2x16x128xf32>
    %c0_7 = arith.constant 0 : index
    %c0_8 = arith.constant 0 : index
    %15 = vector.load %arg4[%c0_7, %c0_8] : memref<16x128xf32, #tpu.memory_space<vmem>>, vector<16x128xf32>
    %16 = vector.shape_cast %15 : vector<16x128xf32> to vector<1x16x128xf32>
    %17 = vector.broadcast %16 : vector<1x16x128xf32> to vector<2x16x128xf32>
    %18 = arith.mulf %14, %17 : vector<2x16x128xf32>
    %cst_9 = arith.constant dense<0.000000e+00> : vector<2x16xf32>
    %19 = vector.multi_reduction <add>, %18, %cst_9 [2] : vector<2x16x128xf32> to vector<2x16xf32>
    %cst_10 = arith.constant dense<0.000000e+00> : vector<2xf32>
    %20 = vector.multi_reduction <add>, %19, %cst_10 [1] : vector<2x16xf32> to vector<2xf32>
    %21 = vector.shape_cast %20 : vector<2xf32> to vector<2x1xf32>
    %22 = arith.negf %21 : vector<2x1xf32>
    %23 = math.exp %22 : vector<2x1xf32>
    %cst_11 = arith.constant 1.000000e+00 : f32
    %24 = vector.broadcast %cst_11 : f32 to vector<2x1xf32>
    %25 = arith.addf %24, %23 : vector<2x1xf32>
    %26 = arith.divf %24, %25 : vector<2x1xf32>
    %27 = vector.shape_cast %26 : vector<2x1xf32> to vector<2x1xf32>
    %28 = vector.broadcast %27 : vector<2x1xf32> to vector<2x128xf32>
    %c0_12 = arith.constant 0 : index
    %c0_13 = arith.constant 0 : index
    %29 = vector.load %arg5[%c0_12, %c0_13] : memref<2x128xf32, #tpu.memory_space<vmem>>, vector<2x128xf32>
    tpu.vector_store %arg5[%c0_12, %c0_13], %28 {strides = array<i32>} : memref<2x128xf32, #tpu.memory_space<vmem>>, vector<2x128xf32>,
    return
  }
  func.func @transform_0(%arg0: i32) -> (i32, i32, i32) {
    %c0_i32 = arith.constant 0 : i32
    %c0_i32_0 = arith.constant 0 : i32
    %c0_i32_1 = arith.constant 0 : i32
    %c0_i32_2 = arith.constant 0 : i32
    return %c0_i32, %c0_i32_0, %c0_i32_1 : i32, i32, i32
  }
  func.func @transform_1(%arg0: i32) -> (i32, i32) {
    %c0_i32 = arith.constant 0 : i32
    %c0_i32_0 = arith.constant 0 : i32
    %c0_i32_1 = arith.constant 0 : i32
    return %c0_i32, %c0_i32_0 : i32, i32
  }
  func.func @transform_2(%arg0: i32) -> (i32, i32) {
    %c0_i32 = arith.constant 0 : i32
    %c0_i32_0 = arith.constant 0 : i32
    %c0_i32_1 = arith.constant 0 : i32
    return %c0_i32, %c0_i32_0 : i32, i32
  }
  func.func @transform_3(%arg0: i32) -> (i32, i32) {
    %c0_i32 = arith.constant 0 : i32
    %c0_i32_0 = arith.constant 0 : i32
    %c0_i32_1 = arith.constant 0 : i32
    return %c0_i32, %c0_i32_0 : i32, i32
  }
  func.func @transform_4(%arg0: i32) -> (i32, i32) {
    %c0_i32 = arith.constant 0 : i32
    %c0_i32_0 = arith.constant 0 : i32
    %c0_i32_1 = arith.constant 0 : i32
    return %c0_i32, %c0_i32_0 : i32, i32
  }
}

</mosaic_0001>

<bundles_post_ra>
// kernel: dcgan_discriminator_forward.4
= control target key start
LH: loop header
LB: loop body
LE: loop exit
PB: predicated region body
PF: predicated region fallthrough
CT: control target
= control target key end

     0   :  { %s581_s1 = inlined_call_operand.vmem [shape: bf16[128,128], index: 1, kind: input, shape index: {}]   ;;  %s582_s0 = inlined_call_operand.vmem [shape: bf16[128,128], index: 0, kind: input, shape index: {}]   ;;  %s583_s2 = inlined_call_operand.vmem [shape: bf16[128,128], index: 2, kind: output, shape index: {0}]   ;;  %s584_s3 = inlined_call_operand.vmem [shape: f32[1,2,128], index: 3, kind: output, shape index: {1}]  }
   0x1   :  { %v386_v0 = vld [vmem:[%s581_s1 + $0x38] sm:$0xff]  ;;  %v385_v1 = vld [vmem:[%s581_s1 + $0x30] sm:$0xff]  ;;  %v384_v2 = vld [vmem:[%s581_s1 + $0x28] sm:$0xff] }
   0x2   :  { %141 = vmatpush.bf16.msra.mxu0 %v386_v0  ;;  %434 = vmatpush.bf16.msra.mxu1 %v386_v0  ;;  %v383_v3 = vld [vmem:[%s581_s1 + $0x20] sm:$0xff]  ;;  %v382_v4 = vld [vmem:[%s581_s1 + $0x18] sm:$0xff]  ;;  %v381_v5 = vld [vmem:[%s581_s1 + $0x10] sm:$0xff] }
   0x3   :  { %435 = vmatpush.bf16.msra.mxu2 %v386_v0  ;;  %436 = vmatpush.bf16.msra.mxu3 %v386_v0  ;;  %v380_v6 = vld [vmem:[%s581_s1 + $0x8] sm:$0xff]  ;;  %v379_v7 = vld [vmem:[%s581_s1] sm:$0xff]  ;;  %v373_v9 = vld [vmem:[%s582_s0 + $0x10] sm:$0xff] }
   0x4   :  { %v371_v8 = vld [vmem:[%s582_s0] sm:$0xff]  ;;  %v377_v11 = vld [vmem:[%s582_s0 + $0x30] sm:$0xff]  ;;  %v372_v12 = vld [vmem:[%s582_s0 + $0x8] sm:$0xff] }
   0x5   :  { %v375_v10 = vld [vmem:[%s582_s0 + $0x20] sm:$0xff]  ;;  %v374_v13 = vld [vmem:[%s582_s0 + $0x18] sm:$0xff]  ;;  %v376_v14 = vld [vmem:[%s582_s0 + $0x28] sm:$0xff] }
   0x6   :  { %142 = vmatpush.bf16.msra.mxu0 %v385_v1  ;;  %437 = vmatpush.bf16.msra.mxu1 %v385_v1  ;;  %v378_v15 = vld [vmem:[%s582_s0 + $0x38] sm:$0xff] }
   0x7   :  { %438 = vmatpush.bf16.msra.mxu2 %v385_v1  ;;  %439 = vmatpush.bf16.msra.mxu3 %v385_v1 }
   0xa   :  { %143 = vmatpush.bf16.msra.mxu0 %v384_v2  ;;  %440 = vmatpush.bf16.msra.mxu1 %v384_v2 }
   0xb   :  { %441 = vmatpush.bf16.msra.mxu2 %v384_v2  ;;  %442 = vmatpush.bf16.msra.mxu3 %v384_v2 }
   0xe   :  { %144 = vmatpush.bf16.msra.mxu0 %v383_v3  ;;  %443 = vmatpush.bf16.msra.mxu1 %v383_v3 }
   0xf   :  { %444 = vmatpush.bf16.msra.mxu2 %v383_v3  ;;  %445 = vmatpush.bf16.msra.mxu3 %v383_v3 }
  0x12   :  { %145 = vmatpush.bf16.msra.mxu0 %v382_v4  ;;  %446 = vmatpush.bf16.msra.mxu1 %v382_v4 }
  0x13   :  { %447 = vmatpush.bf16.msra.mxu2 %v382_v4  ;;  %448 = vmatpush.bf16.msra.mxu3 %v382_v4 }
  0x16   :  { %146 = vmatpush.bf16.msra.mxu0 %v381_v5  ;;  %449 = vmatpush.bf16.msra.mxu1 %v381_v5 }
  0x17   :  { %450 = vmatpush.bf16.msra.mxu2 %v381_v5  ;;  %451 = vmatpush.bf16.msra.mxu3 %v381_v5 }
  0x1a   :  { %147 = vmatpush.bf16.msra.mxu0 %v380_v6  ;;  %452 = vmatpush.bf16.msra.mxu1 %v380_v6 }
  0x1b   :  { %453 = vmatpush.bf16.msra.mxu2 %v380_v6  ;;  %454 = vmatpush.bf16.msra.mxu3 %v380_v6 }
  0x1e   :  { %148 = vmatpush.bf16.msra.mxu0 %v379_v7  ;;  %455 = vmatpush.bf16.msra.mxu1 %v379_v7 }
  0x1f   :  { %456 = vmatpush.bf16.msra.mxu2 %v379_v7  ;;  %457 = vmatpush.bf16.msra.mxu3 %v379_v7 }
  0x21   :  { %149 = vmatmul.bf16.vlgmr.msra.gmra.mxu0 %v371_v8  ;;  %159 = vmatmul.bf16.vlgmr.msra.gmra.mxu1 %v373_v9 }
  0x22   :  { %169 = vmatmul.bf16.vlgmr.msra.gmra.mxu2 %v375_v10  ;;  %179 = vmatmul.bf16.vlgmr.msra.gmra.mxu3 %v377_v11 }
  0x31   :  { %154 = vmatmul.bf16.gmra.mxu0 %v372_v12  ;;  %164 = vmatmul.bf16.gmra.mxu1 %v374_v13 }
  0x32   :  { %174 = vmatmul.bf16.gmra.mxu2 %v376_v14  ;;  %184 = vmatmul.bf16.gmra.mxu3 %v378_v15 }
  0x9e   :  { %v150_v16 = vpop.f32.mrf.mxu0  ;;  %v160_v17 = vpop.f32.mrf.mxu1 }
  0xa5   :  { %v526_v18 = vpop.f32.mrf.mxu2  ;;  %v528_v19 = vpop.f32.mrf.mxu3 }
  0xa6   :  { %v152_v20 = vpop.f32.mrf.mxu0  ;;  %v162_v21 = vpop.f32.mrf.mxu1 }
  0xa7   :  { %v390_v22 = vpack.c.bf16 %v152_v20, %v150_v16  ;;  %v400_v23 = vpack.c.bf16 %v162_v21, %v160_v17  ;;  %v222_v30 = vadd.f32 %v152_v20, %v150_v16 }
  0xa9   :  { %391 = vst [vmem:[%s583_s2] sm:$0xff] %v390_v22  }
  0xaa   :  { %428 = vst [vmem:[%s583_s2 + $0x10] sm:$0xff] %v400_v23  }
  0xad   :  { %v536_v24 = vpop.f32.mrf.mxu2  ;;  %v538_v25 = vpop.f32.mrf.mxu3 }
  0xae   :  { %v155_v26 = vpop.f32.mrf.mxu0  ;;  %v165_v27 = vpop.f32.mrf.mxu1  ;;  %v410_v28 = vpack.c.bf16 %v536_v24, %v526_v18  ;;  %v420_v29 = vpack.c.bf16 %v538_v25, %v528_v19 }
  0xaf   :  { %v223_v31 = vadd.f32 %v222_v30, %v155_v26 }
  0xb0   :  { %430 = vst [vmem:[%s583_s2 + $0x20] sm:$0xff] %v410_v28  }
  0xb1   :  { %432 = vst [vmem:[%s583_s2 + $0x30] sm:$0xff] %v420_v29  }
  0xb5   :  { %v175_v32 = vpop.f32.mrf.mxu2  ;;  %v550_v33 = vpop.f32.mrf.mxu3 }
  0xb6   :  { %v157_v34 = vpop.f32.mrf.mxu0  ;;  %v167_v35 = vpop.f32.mrf.mxu1 }
  0xb7   :  { %v395_v36 = vpack.c.bf16 %v157_v34, %v155_v26  ;;  %v224_v37 = vadd.f32 %v223_v31, %v157_v34  ;;  %v405_v38 = vpack.c.bf16 %v167_v35, %v165_v27 }
  0xb9   :  { %427 = vst [vmem:[%s583_s2 + $0x8] sm:$0xff] %v395_v36   ;;  %v225_v39 = vadd.f32 %v224_v37, %v160_v17 }
  0xba   :  { %429 = vst [vmem:[%s583_s2 + $0x18] sm:$0xff] %v405_v38  }
  0xbb   :  { %v226_v40 = vadd.f32 %v225_v39, %v162_v21 }
  0xbd   :  { %v227_v41 = vadd.f32 %v226_v40, %v165_v27  ;;  %v177_v42 = vpop.f32.mrf.mxu2  ;;  %v187_v43 = vpop.f32.mrf.mxu3 }
  0xbe   :  { %v415_v44 = vpack.c.bf16 %v177_v42, %v175_v32  ;;  %v425_v45 = vpack.c.bf16 %v187_v43, %v550_v33 }
  0xbf   :  { %v228_v46 = vadd.f32 %v227_v41, %v167_v35 }
  0xc0   :  { %431 = vst [vmem:[%s583_s2 + $0x28] sm:$0xff] %v415_v44  }
  0xc1   :  { %v229_v47 = vadd.f32 %v228_v46, %v526_v18  ;;  %433 = vst [vmem:[%s583_s2 + $0x38] sm:$0xff] %v425_v45  }
  0xc3   :  { %v230_v48 = vadd.f32 %v229_v47, %v536_v24 }
  0xc5   :  { %v231_v49 = vadd.f32 %v230_v48, %v175_v32 }
  0xc7   :  { %v232_v50 = vadd.f32 %v231_v49, %v177_v42 }
  0xc9   :  { %v233_v51 = vadd.f32 %v232_v50, %v528_v19 }
  0xcb   :  { %v234_v52 = vadd.f32 %v233_v51, %v538_v25 }
  0xcd   :  { %v235_v53 = vadd.f32 %v234_v52, %v550_v33 }
  0xcf   :  { %v236_v54 = vadd.f32 %v235_v53, %v187_v43 }
  0xd1   :  { %v237_v55 = vrot.slane %v236_v54, 4 }
  0xd3   :  { %v238_v56 = vadd.f32 %v237_v55, %v236_v54 }
  0xd5   :  { %v239_v57 = vrot.slane %v238_v56, 2 }
  0xd7   :  { %v240_v58 = vadd.f32 %v239_v57, %v238_v56 }
  0xd9   :  { %v241_v59 = vrot.slane %v240_v58, 1 }
  0xdb   :  { %v242_v60 = vadd.f32 %v241_v59, %v240_v58 }
  0xdd   :  { %v243_v61 = vmul.f32 0.0078125, %v242_v60  ;;  %260 = vst [vmem:[%s584_s3] sm:$0x1] %v242_v60 }
  0xdf   :  { %v244_v62 = vsub.f32 %v150_v16, %v243_v61  ;;  %v245_v63 = vsub.f32 %v152_v20, %v243_v61  ;;  %v246_v0 = vsub.f32 %v155_v26, %v243_v61  ;;  %v247_v3 = vsub.f32 %v157_v34, %v243_v61 }
  0xe0   :  { %v248_v4 = vsub.f32 %v160_v17, %v243_v61  ;;  %v249_v7 = vsub.f32 %v162_v21, %v243_v61  ;;  %v250_v10 = vsub.f32 %v165_v27, %v243_v61  ;;  %v251_v13 = vsub.f32 %v167_v35, %v243_v61 }
  0xe1   :  { %v261_v1 = vmul.f32 %v244_v62, %v244_v62  ;;  %v262_v2 = vmul.f32 %v245_v63, %v245_v63  ;;  %v263_v5 = vmul.f32 %v246_v0, %v246_v0  ;;  %v264_v8 = vmul.f32 %v247_v3, %v247_v3 }
  0xe2   :  { %v265_v11 = vmul.f32 %v248_v4, %v248_v4  ;;  %v266_v14 = vmul.f32 %v249_v7, %v249_v7  ;;  %v252_v22 = vsub.f32 %v526_v18, %v243_v61  ;;  %v267_v16 = vmul.f32 %v250_v10, %v250_v10 }
  0xe3   :  { %v277_v6 = vadd.f32 %v262_v2, %v261_v1  ;;  %v253_v23 = vsub.f32 %v536_v24, %v243_v61  ;;  %v268_v26 = vmul.f32 %v251_v13, %v251_v13  ;;  %v254_v17 = vsub.f32 %v175_v32, %v243_v61 }
  0xe4   :  { %v269_v29 = vmul.f32 %v252_v22, %v252_v22  ;;  %v255_v21 = vsub.f32 %v177_v42, %v243_v61  ;;  %v256_v27 = vsub.f32 %v528_v19, %v243_v61  ;;  %v257_v37 = vsub.f32 %v538_v25, %v243_v61 }
  0xe5   :  { %v278_v9 = vadd.f32 %v277_v6, %v263_v5  ;;  %v270_v31 = vmul.f32 %v253_v23, %v253_v23  ;;  %v271_v36 = vmul.f32 %v254_v17, %v254_v17  ;;  %v258_v39 = vsub.f32 %v550_v33, %v243_v61 }
  0xe6   :  { %v272_v38 = vmul.f32 %v255_v21, %v255_v21  ;;  %v273_v40 = vmul.f32 %v256_v27, %v256_v27  ;;  %v259_v41 = vsub.f32 %v187_v43, %v243_v61  ;;  %v274_v44 = vmul.f32 %v257_v37, %v257_v37 }
  0xe7   :  { %v279_v12 = vadd.f32 %v278_v9, %v264_v8  ;;  %v275_v45 = vmul.f32 %v258_v39, %v258_v39 }
  0xe8   :  { %v276_v42 = vmul.f32 %v259_v41, %v259_v41 }
  0xe9   :  { %v280_v15 = vadd.f32 %v279_v12, %v265_v11 }
  0xeb   :  { %v281_v20 = vadd.f32 %v280_v15, %v266_v14 }
  0xed   :  { %v282_v28 = vadd.f32 %v281_v20, %v267_v16 }
  0xef   :  { %v283_v30 = vadd.f32 %v282_v28, %v268_v26 }
  0xf1   :  { %v284_v34 = vadd.f32 %v283_v30, %v269_v29 }
  0xf3   :  { %v285_v35 = vadd.f32 %v284_v34, %v270_v31 }
  0xf5   :  { %v286_v18 = vadd.f32 %v285_v35, %v271_v36 }
  0xf7   :  { %v287_v24 = vadd.f32 %v286_v18, %v272_v38 }
  0xf9   :  { %v288_v32 = vadd.f32 %v287_v24, %v273_v40 }
  0xfb   :  { %v289_v46 = vadd.f32 %v288_v32, %v274_v44 }
  0xfd   :  { %v290_v47 = vadd.f32 %v289_v46, %v275_v45 }
  0xff   :  { %v291_v48 = vadd.f32 %v290_v47, %v276_v42 }
 0x101   :  { %v292_v49 = vrot.slane %v291_v48, 4 }
 0x103   :  { %v293_v19 = vadd.f32 %v292_v49, %v291_v48 }
 0x105   :  { %v294_v50 = vrot.slane %v293_v19, 2 }
 0x107   :  { %v295_v51 = vadd.f32 %v294_v50, %v293_v19 }
 0x109   :  { %v296_v52 = vrot.slane %v295_v51, 1 }
 0x10b   :  { %v297_v25 = vadd.f32 %v296_v52, %v295_v51 }
 0x10d   :  { %298 = vst [vmem:[%s584_s3 + $0x1] sm:$0x1] %v297_v25 }

// kernel: dcgan_discriminator_forward.5
= control target key start
LH: loop header
LB: loop body
LE: loop exit
PB: predicated region body
PF: predicated region fallthrough
CT: control target
= control target key end

     0   :  { %s368_s0 = inlined_call_operand.vmem [shape: bf16[128,128], index: 0, kind: input, shape index: {}]   ;;  %s369_s1 = inlined_call_operand.vmem [shape: f32[1,128], index: 1, kind: input, shape index: {}]   ;;  %s370_s2 = inlined_call_operand.vmem [shape: f32[1,128], index: 2, kind: input, shape index: {}]   ;;  %s371_s3 = inlined_call_operand.vmem [shape: bf16[128,128], index: 3, kind: output, shape index: {}]  }
   0x1   :  { %v171_v0 = vld [vmem:[%s368_s0] sm:$0xff]   ;;  %v242_v5 = vld [vmem:[%s368_s0 + $0x8] sm:$0xff]   ;;  %v243_v8 = vld [vmem:[%s368_s0 + $0x10] sm:$0xff]  }
   0x2   :  { %v284_v1 = vld [vmem:[%s369_s1] ss:$0 sm:$0xff]  ;;  %v172_v2 = vunpack.c.l.bf16 %v171_v0  ;;  %v173_v3 = vunpack.c.h.bf16 %v171_v0  ;;  %v176_v6 = vunpack.c.l.bf16 %v242_v5  ;;  %v177_v7 = vunpack.c.h.bf16 %v242_v5  ;;  %v244_v9 = vld [vmem:[%s368_s0 + $0x18] sm:$0xff]   ;;  %v246_v39 = vld [vmem:[%s368_s0 + $0x28] sm:$0xff]  }
   0x3   :  { %v289_v4 = vld [vmem:[%s370_s2] ss:$0 sm:$0xff]  ;;  %v180_v12 = vunpack.c.l.bf16 %v243_v8  ;;  %v181_v13 = vunpack.c.h.bf16 %v243_v8  ;;  %v184_v16 = vunpack.c.l.bf16 %v244_v9  ;;  %v185_v17 = vunpack.c.h.bf16 %v244_v9  ;;  %v247_v49 = vld [vmem:[%s368_s0 + $0x30] sm:$0xff]   ;;  %v248_v57 = vld [vmem:[%s368_s0 + $0x38] sm:$0xff]  }
   0x4   :  { %v50_v10 = vmul.f32 %v284_v1, %v172_v2  ;;  %v51_v11 = vmul.f32 %v284_v1, %v173_v3  ;;  %v52_v14 = vmul.f32 %v284_v1, %v176_v6  ;;  %v53_v15 = vmul.f32 %v284_v1, %v177_v7  ;;  %v245_v38 = vld [vmem:[%s368_s0 + $0x20] sm:$0xff]  }
   0x5   :  { %v54_v20 = vmul.f32 %v284_v1, %v180_v12  ;;  %v55_v21 = vmul.f32 %v284_v1, %v181_v13  ;;  %v56_v24 = vmul.f32 %v284_v1, %v184_v16  ;;  %v57_v25 = vmul.f32 %v284_v1, %v185_v17 }
   0x6   :  { %v70_v18 = vadd.f32 %v289_v4, %v50_v10  ;;  %v71_v19 = vadd.f32 %v289_v4, %v51_v11  ;;  %v72_v22 = vadd.f32 %v289_v4, %v52_v14  ;;  %v73_v23 = vadd.f32 %v289_v4, %v53_v15 }
   0x7   :  { %v74_v32 = vadd.f32 %v289_v4, %v54_v20  ;;  %v75_v33 = vadd.f32 %v289_v4, %v55_v21  ;;  %v76_v37 = vadd.f32 %v289_v4, %v56_v24  ;;  %v77_v43 = vadd.f32 %v289_v4, %v57_v25 }
   0x8   :  { %vm86_vm0 = vcmp.gt.f32.partialorder %v70_v18, 0.0  ;;  %vm87_vm1 = vcmp.gt.f32.partialorder %v71_v19, 0.0  ;;  %v102_v26 = vmul.f32 0.2, %v70_v18  ;;  %v103_v27 = vmul.f32 0.2, %v71_v19 }
   0x9   :  { %vm88_vm2 = vcmp.gt.f32.partialorder %v72_v22, 0.0  ;;  %vm89_vm3 = vcmp.gt.f32.partialorder %v73_v23, 0.0  ;;  %v104_v28 = vmul.f32 0.2, %v72_v22  ;;  %v105_v29 = vmul.f32 0.2, %v73_v23 }
   0xa   :  { %v118_v30 = vsel %vm86_vm0, %v70_v18, %v102_v26  ;;  %v119_v31 = vsel %vm87_vm1, %v71_v19, %v103_v27  ;;  %vm90_vm4 = vcmp.gt.f32.partialorder %v74_v32, 0.0  ;;  %vm91_vm5 = vcmp.gt.f32.partialorder %v75_v33, 0.0 }
   0xb   :  { %v205_v34 = vpack.c.bf16 %v119_v31, %v118_v30  ;;  %v120_v35 = vsel %vm88_vm2, %v72_v22, %v104_v28  ;;  %v121_v36 = vsel %vm89_vm3, %v73_v23, %v105_v29  ;;  %v106_v41 = vmul.f32 0.2, %v74_v32 }
   0xc   :  { %v210_v40 = vpack.c.bf16 %v121_v36, %v120_v35  ;;  %v107_v42 = vmul.f32 0.2, %v75_v33  ;;  %vm92_vm6 = vcmp.gt.f32.partialorder %v76_v37, 0.0  ;;  %v108_v44 = vmul.f32 0.2, %v76_v37 }
   0xd   :  { %206 = vst [vmem:[%s371_s3] sm:$0xff] %v205_v34   ;;  %v122_v45 = vsel %vm90_vm4, %v74_v32, %v106_v41  ;;  %v188_v46 = vunpack.c.l.bf16 %v245_v38  ;;  %v189_v47 = vunpack.c.h.bf16 %v245_v38  ;;  %v192_v48 = vunpack.c.l.bf16 %v246_v39 }
   0xe   :  { %249 = vst [vmem:[%s371_s3 + $0x8] sm:$0xff] %v210_v40   ;;  %v123_v50 = vsel %vm91_vm5, %v75_v33, %v107_v42  ;;  %vm93_vm7 = vcmp.gt.f32.partialorder %v77_v43, 0.0  ;;  %v109_v51 = vmul.f32 0.2, %v77_v43  ;;  %v124_v52 = vsel %vm92_vm6, %v76_v37, %v108_v44 }
   0xf   :  { %v215_v53 = vpack.c.bf16 %v123_v50, %v122_v45  ;;  %v58_v54 = vmul.f32 %v284_v1, %v188_v46  ;;  %v59_v55 = vmul.f32 %v284_v1, %v189_v47  ;;  %v193_v56 = vunpack.c.h.bf16 %v246_v39 }
  0x10   :  { %v125_v58 = vsel %vm93_vm7, %v77_v43, %v109_v51  ;;  %v60_v59 = vmul.f32 %v284_v1, %v192_v48  ;;  %v196_v60 = vunpack.c.l.bf16 %v247_v49  ;;  %v197_v61 = vunpack.c.h.bf16 %v247_v49 }
  0x11   :  { %250 = vst [vmem:[%s371_s3 + $0x10] sm:$0xff] %v215_v53   ;;  %v220_v62 = vpack.c.bf16 %v125_v58, %v124_v52  ;;  %v78_v63 = vadd.f32 %v289_v4, %v58_v54  ;;  %v79_v0 = vadd.f32 %v289_v4, %v59_v55  ;;  %v61_v2 = vmul.f32 %v284_v1, %v193_v56 }
  0x12   :  { %v80_v3 = vadd.f32 %v289_v4, %v60_v59  ;;  %v62_v5 = vmul.f32 %v284_v1, %v196_v60  ;;  %v63_v6 = vmul.f32 %v284_v1, %v197_v61  ;;  %v200_v7 = vunpack.c.l.bf16 %v248_v57 }
  0x13   :  { %251 = vst [vmem:[%s371_s3 + $0x18] sm:$0xff] %v220_v62   ;;  %vm94_vm8 = vcmp.gt.f32.partialorder %v78_v63, 0.0  ;;  %vm95_vm9 = vcmp.gt.f32.partialorder %v79_v0, 0.0  ;;  %v110_v8 = vmul.f32 0.2, %v78_v63  ;;  %v81_v9 = vadd.f32 %v289_v4, %v61_v2 }
  0x14   :  { %v111_v10 = vmul.f32 0.2, %v79_v0  ;;  %vm96_vm10 = vcmp.gt.f32.partialorder %v80_v3, 0.0  ;;  %v112_v11 = vmul.f32 0.2, %v80_v3  ;;  %v82_v12 = vadd.f32 %v289_v4, %v62_v5 }
  0x15   :  { %v126_v13 = vsel %vm94_vm8, %v78_v63, %v110_v8  ;;  %vm97_vm11 = vcmp.gt.f32.partialorder %v81_v9, 0.0  ;;  %v113_v14 = vmul.f32 0.2, %v81_v9  ;;  %v83_v15 = vadd.f32 %v289_v4, %v63_v6 }
  0x16   :  { %v127_v16 = vsel %vm95_vm9, %v79_v0, %v111_v10  ;;  %v128_v17 = vsel %vm96_vm10, %v80_v3, %v112_v11  ;;  %vm98_vm12 = vcmp.gt.f32.partialorder %v82_v12, 0.0  ;;  %v114_v18 = vmul.f32 0.2, %v82_v12 }
  0x17   :  { %v225_v19 = vpack.c.bf16 %v127_v16, %v126_v13  ;;  %v129_v20 = vsel %vm97_vm11, %v81_v9, %v113_v14  ;;  %vm99_vm13 = vcmp.gt.f32.partialorder %v83_v15, 0.0  ;;  %v115_v21 = vmul.f32 0.2, %v83_v15 }
  0x18   :  { %v230_v22 = vpack.c.bf16 %v129_v20, %v128_v17  ;;  %v130_v23 = vsel %vm98_vm12, %v82_v12, %v114_v18  ;;  %v201_v24 = vunpack.c.h.bf16 %v248_v57  ;;  %v64_v25 = vmul.f32 %v284_v1, %v200_v7 }
  0x19   :  { %252 = vst [vmem:[%s371_s3 + $0x20] sm:$0xff] %v225_v19   ;;  %v131_v26 = vsel %vm99_vm13, %v83_v15, %v115_v21 }
  0x1a   :  { %253 = vst [vmem:[%s371_s3 + $0x28] sm:$0xff] %v230_v22   ;;  %v235_v27 = vpack.c.bf16 %v131_v26, %v130_v23  ;;  %v65_v28 = vmul.f32 %v284_v1, %v201_v24  ;;  %v84_v29 = vadd.f32 %v289_v4, %v64_v25 }
  0x1c   :  { %254 = vst [vmem:[%s371_s3 + $0x30] sm:$0xff] %v235_v27   ;;  %v85_v30 = vadd.f32 %v289_v4, %v65_v28  ;;  %vm100_vm14 = vcmp.gt.f32.partialorder %v84_v29, 0.0  ;;  %v116_v31 = vmul.f32 0.2, %v84_v29 }
  0x1e   :  { %vm101_vm15 = vcmp.gt.f32.partialorder %v85_v30, 0.0  ;;  %v117_v32 = vmul.f32 0.2, %v85_v30  ;;  %v132_v33 = vsel %vm100_vm14, %v84_v29, %v116_v31 }
  0x20   :  { %v133_v34 = vsel %vm101_vm15, %v85_v30, %v117_v32 }
  0x21   :  { %v240_v35 = vpack.c.bf16 %v133_v34, %v132_v33 }
  0x23   :  { %255 = vst [vmem:[%s371_s3 + $0x38] sm:$0xff] %v240_v35  }

// kernel: dcgan_discriminator_forward.7
= control target key start
LH: loop header
LB: loop body
LE: loop exit
PB: predicated region body
PF: predicated region fallthrough
CT: control target
= control target key end

     0   :  { %v71_v30 = vlaneseq  ;;  %vm76_vm4 = vcmask 130112   ;;  %vm81_vm5 = vcmask 1041409   ;;  %vm84_vm6 = vcmask 123904   ;;  %s174_s0 = inlined_call_operand.vmem [shape: bf16[2,16,128], index: 0, kind: input, shape index: {}]   ;;  %s175_s1 = inlined_call_operand.vmem [shape: f32[1,128], index: 1, kind: input, shape index: {}]   ;;  %s176_s2 = inlined_call_operand.vmem [shape: f32[1,128], index: 2, kind: input, shape index: {}]   ;;  %s177_s3 = inlined_call_operand.vmem [shape: f32[16,128], index: 3, kind: input, shape index: {}]   ;;  %s178_s4 = inlined_call_operand.vmem [shape: f32[2,128], index: 4, kind: output, shape index: {}]  }
   0x1   :  { %v121_v0 = vld [vmem:[%s174_s0 + $0x8] sm:$0xff]   ;;  %v122_v1 = vld [vmem:[%s175_s1] ss:$0 sm:$0xff] }
   0x2   :  { %v119_v2 = vunpack.c.l.bf16 %v121_v0  ;;  %v123_v3 = vld [vmem:[%s176_s2] ss:$0 sm:$0xff]  ;;  %v120_v4 = vunpack.c.h.bf16 %v121_v0  ;;  %v54_v26 = vld [vmem:[%s177_s3 + $0x8] sm:$0xff]  ;;  %v72_v33 = vand.u32 127, %v71_v30 }
   0x3   :  { %v114_v5 = vld [vmem:[%s174_s0] sm:$0xff]  }
   0x4   :  { %v31_v6 = vmul.f32 %v122_v1, %v119_v2  ;;  %v115_v7 = vunpack.c.l.bf16 %v114_v5  ;;  %v32_v8 = vmul.f32 %v122_v1, %v120_v4  ;;  %v116_v9 = vunpack.c.h.bf16 %v114_v5  ;;  %v53_v15 = vld [vmem:[%s177_s3] sm:$0xff] }
   0x5   :  { %v74_v34 = vadd.s32 4294967288, %v72_v33 }
   0x6   :  { %v39_v10 = vadd.f32 %v123_v3, %v31_v6  ;;  %v29_v11 = vmul.f32 %v122_v1, %v115_v7  ;;  %v40_v12 = vadd.f32 %v123_v3, %v32_v8  ;;  %v30_v13 = vmul.f32 %v122_v1, %v116_v9 }
   0x8   :  { %vm43_vm0 = vcmp.gt.f32.partialorder %v39_v10, 0.0  ;;  %v47_v14 = vmul.f32 0.2, %v39_v10  ;;  %v37_v16 = vadd.f32 %v123_v3, %v29_v11  ;;  %v38_v17 = vadd.f32 %v123_v3, %v30_v13 }
   0x9   :  { %v48_v20 = vmul.f32 0.2, %v40_v12  ;;  %vm44_vm2 = vcmp.gt.f32.partialorder %v40_v12, 0.0 }
   0xa   :  { %v51_v18 = vsel %vm43_vm0, %v39_v10, %v47_v14  ;;  %vm41_vm1 = vcmp.gt.f32.partialorder %v37_v16, 0.0  ;;  %v45_v19 = vmul.f32 0.2, %v37_v16  ;;  %v46_v23 = vmul.f32 0.2, %v38_v17 }
   0xb   :  { %v57_v21 = vmul.f32 %v53_v15, %v51_v18  ;;  %vm42_vm3 = vcmp.gt.f32.partialorder %v38_v17, 0.0  ;;  %v52_v25 = vsel %vm44_vm2, %v40_v12, %v48_v20 }
   0xc   :  { %v49_v22 = vsel %vm41_vm1, %v37_v16, %v45_v19  ;;  %v50_v27 = vsel %vm42_vm3, %v38_v17, %v46_v23  ;;  %v58_v28 = vmul.f32 %v54_v26, %v52_v25 }
   0xd   :  { %63 = vadd.xlane.f32.xlu1 %v57_v21  ;;  %v55_v24 = vmul.f32 %v53_v15, %v49_v22  ;;  %v56_v29 = vmul.f32 %v54_v26, %v50_v27 }
   0xf   :  { %59 = vadd.xlane.f32.xlu0 %v55_v24 }
  0x15   :  { %65 = vadd.xlane.f32.xlu1 %v58_v28 }
  0x17   :  { %61 = vadd.xlane.f32.xlu0 %v56_v29 }
  0x80   :  { %v64_v31 = vpop.xlane.xlu1 %63 }
  0x81   :  { %v78_v36 = vperm.slane %v64_v31, %v72_v33 }
  0x82   :  { %v60_v32 = vpop.xlane.xlu0 %59 }
  0x83   :  { %v73_v39 = vperm.slane %v60_v32, %v72_v33 }
  0x88   :  { %v66_v35 = vpop.xlane.xlu1 %65 }
  0x89   :  { %v79_v37 = vperm.slane %v66_v35, %v74_v34 }
  0x8a   :  { %v62_v38 = vpop.xlane.xlu0 %61 }
  0x8b   :  { %v75_v40 = vperm.slane %v62_v38, %v74_v34  ;;  %v80_v41 = vsel %vm76_vm4, %v79_v37, %v78_v36 }
  0x8d   :  { %v77_v42 = vsel %vm76_vm4, %v75_v40, %v73_v39 }
  0x8e   :  { %v82_v43 = vsel %vm81_vm5, %v80_v41, %v77_v42 }
  0x8f   :  { %v85_v44 = vsel %vm84_vm6, %v82_v43, 0.0 }
  0x90   :  { %86 = vadd.xlane.f32.xlu2 %v85_v44 }
 0x103   :  { %v87_v45 = vpop.xlane.xlu2 %86 }
 0x104   :  { %v112_v46 = vmul.f32 -1.442695, %v87_v45 }
 0x106   :  { %124 = vpow2.f32 %v112_v46 }
 0x10c   :  { %v125_v47 = vpop.eup %124 }
 0x10d   :  { %v91_v48 = vadd.f32 1.0, %v125_v47 }
 0x10f   :  { %126 = vrcp.f32 %v91_v48  ;;  %v103_v52 = vand.u32 2147483648, %v91_v48  ;;  %v101_v54 = vand.u32 2147483647, %v91_v48  ;;  %vm97_vm8 = vweird.f32 %v91_v48 }
 0x111   :  { %v104_v56 = vor.u32 1.1754944e-38, %v103_v52  ;;  %vm102_vm10 = vcmp.eq.f32.partialorder %v101_v54, 8.507059e+37 }
 0x115   :  { %v127_v49 = vpop.eup %126 }
 0x116   :  { %v93_v50 = vmul.f32 %v127_v49, %v91_v48  ;;  %vm98_vm7 = vweird.f32 %v127_v49 }
 0x117   :  { %vm99_vm9 = vmor %vm97_vm8, %vm98_vm7 }
 0x118   :  { %v94_v51 = vsub.f32 1.0, %v93_v50 }
 0x11a   :  { %v95_v53 = vmul.f32 %v127_v49, %v94_v51 }
 0x11c   :  { %v96_v55 = vadd.f32 %v127_v49, %v95_v53 }
 0x11e   :  { %v100_v57 = vsel %vm99_vm9, %v127_v49, %v96_v55 }
 0x11f   :  { %v105_v58 = vsel %vm102_vm10, %v104_v56, %v100_v57 }
 0x120   :  { %107 = vst [vmem:[%s178_s4] sm:$0x3] %v105_v58 }

// kernel: dcgan_discriminator_forward.6
= control target key start
LH: loop header
LB: loop body
LE: loop exit
PB: predicated region body
PF: predicated region fallthrough
CT: control target
= control target key end

     0   :  { %vm760_vm0 = vcmask 1045504   ;;  %s5994_s1 = inlined_call_operand.vmem [shape: bf16[8,256,128], index: 1, kind: input, shape index: {}]   ;;  %s5995_s0 = inlined_call_operand.vmem [shape: bf16[4,2,20,256], index: 0, kind: input, shape index: {}]   ;;  %s5996_s2 = inlined_call_operand.vmem [shape: bf16[2,16,128], index: 2, kind: output, shape index: {0}]   ;;  %s5997_s3 = inlined_call_operand.vmem [shape: f32[2,2,128], index: 3, kind: output, shape index: {1}]  }
   0x1   :  { %v4612_v0 = vld [vmem:[%s5994_s1 + $0x38] sm:$0xff]  ;;  %v4611_v4 = vld [vmem:[%s5994_s1 + $0x30] sm:$0xff]  ;;  %v4610_v8 = vld [vmem:[%s5994_s1 + $0x28] sm:$0xff] }
   0x2   :  { %v4620_v1 = vld [vmem:[%s5994_s1 + $0x78] sm:$0xff]  ;;  %153 = vmatpush.bf16.msra.mxu0 %v4612_v0  ;;  %v4619_v5 = vld [vmem:[%s5994_s1 + $0x70] sm:$0xff]  ;;  %v4618_v9 = vld [vmem:[%s5994_s1 + $0x68] sm:$0xff] }
   0x3   :  { %v4630_v2 = vld [vmem:[%s5994_s1 + $0xb8] sm:$0xff]  ;;  %167 = vmatpush.bf16.msra.mxu1 %v4620_v1  ;;  %v4629_v6 = vld [vmem:[%s5994_s1 + $0xb0] sm:$0xff]  ;;  %v4628_v10 = vld [vmem:[%s5994_s1 + $0xa8] sm:$0xff] }
   0x4   :  { %v4638_v3 = vld [vmem:[%s5994_s1 + $0xf8] sm:$0xff]  ;;  %325 = vmatpush.bf16.msra.mxu2 %v4630_v2  ;;  %v4637_v7 = vld [vmem:[%s5994_s1 + $0xf0] sm:$0xff]  ;;  %v4636_v11 = vld [vmem:[%s5994_s1 + $0xe8] sm:$0xff] }
   0x5   :  { %339 = vmatpush.bf16.msra.mxu3 %v4638_v3  ;;  %v4609_v12 = vld [vmem:[%s5994_s1 + $0x20] sm:$0xff]  ;;  %v4608_v16 = vld [vmem:[%s5994_s1 + $0x18] sm:$0xff]  ;;  %v4607_v20 = vld [vmem:[%s5994_s1 + $0x10] sm:$0xff] }
   0x6   :  { %154 = vmatpush.bf16.msra.mxu0 %v4611_v4  ;;  %v4617_v13 = vld [vmem:[%s5994_s1 + $0x60] sm:$0xff]  ;;  %v4616_v17 = vld [vmem:[%s5994_s1 + $0x58] sm:$0xff]  ;;  %v4615_v21 = vld [vmem:[%s5994_s1 + $0x50] sm:$0xff] }
   0x7   :  { %168 = vmatpush.bf16.msra.mxu1 %v4619_v5  ;;  %v4627_v14 = vld [vmem:[%s5994_s1 + $0xa0] sm:$0xff]  ;;  %v4626_v18 = vld [vmem:[%s5994_s1 + $0x98] sm:$0xff]  ;;  %v4625_v22 = vld [vmem:[%s5994_s1 + $0x90] sm:$0xff] }
   0x8   :  { %326 = vmatpush.bf16.msra.mxu2 %v4629_v6  ;;  %v4635_v15 = vld [vmem:[%s5994_s1 + $0xe0] sm:$0xff]  ;;  %v4634_v19 = vld [vmem:[%s5994_s1 + $0xd8] sm:$0xff]  ;;  %v4633_v23 = vld [vmem:[%s5994_s1 + $0xd0] sm:$0xff] }
   0x9   :  { %340 = vmatpush.bf16.msra.mxu3 %v4637_v7  ;;  %v4606_v24 = vld [vmem:[%s5994_s1 + $0x8] sm:$0xff]  ;;  %v4605_v28 = vld [vmem:[%s5994_s1] sm:$0xff]  ;;  %v4648_v32 = vld [vmem:[%s5994_s1 + $0x138] sm:$0xff] }
   0xa   :  { %155 = vmatpush.bf16.msra.mxu0 %v4610_v8  ;;  %v4614_v25 = vld [vmem:[%s5994_s1 + $0x48] sm:$0xff]  ;;  %v4613_v29 = vld [vmem:[%s5994_s1 + $0x40] sm:$0xff]  ;;  %v4656_v33 = vld [vmem:[%s5994_s1 + $0x178] sm:$0xff] }
   0xb   :  { %169 = vmatpush.bf16.msra.mxu1 %v4618_v9  ;;  %v4624_v26 = vld [vmem:[%s5994_s1 + $0x88] sm:$0xff]  ;;  %v4623_v30 = vld [vmem:[%s5994_s1 + $0x80] sm:$0xff]  ;;  %v3072_v38 = vld [vmem:[%s5995_s0 + $0x30] sm:$0xf] }
   0xc   :  { %327 = vmatpush.bf16.msra.mxu2 %v4628_v10  ;;  %v4632_v27 = vld [vmem:[%s5994_s1 + $0xc8] sm:$0xff]  ;;  %v4631_v31 = vld [vmem:[%s5994_s1 + $0xc0] sm:$0xff]  ;;  %v4622_v39 = vld [vmem:[%s5995_s0 + $0x34] sm:$0xf0] }
   0xd   :  { %341 = vmatpush.bf16.msra.mxu3 %v4636_v11  ;;  %v2966_v34 = vld [vmem:[%s5995_s0] sm:$0xf]  ;;  %v4604_v35 = vld [vmem:[%s5995_s0 + $0x4] sm:$0xf0]  ;;  %v4603_v36 = vld [vmem:[%s5995_s0 + $0x4] sm:$0xf]  ;;  %v3073_v46 = vor.u32 %v4622_v39, %v3072_v38 }
   0xe   :  { %156 = vmatpush.bf16.msra.mxu0 %v4609_v12  ;;  %v2968_v37 = vld [vmem:[%s5995_s0 + $0x8] sm:$0xf0]  ;;  %v4621_v40 = vld [vmem:[%s5995_s0 + $0x34] sm:$0xf]  ;;  %v3074_v41 = vld [vmem:[%s5995_s0 + $0x38] sm:$0xf0]  ;;  %v2967_v44 = vor.u32 %v4604_v35, %v2966_v34 }
   0xf   :  { %170 = vmatpush.bf16.msra.mxu1 %v4617_v13  ;;  %v4666_v42 = vld [vmem:[%s5994_s1 + $0x1b8] sm:$0xff]  ;;  %v2971_v45 = vor.u32 %v4603_v36, %v2968_v37  ;;  %v3077_v47 = vor.u32 %v4621_v40, %v3074_v41  ;;  %v4647_v48 = vld [vmem:[%s5994_s1 + $0x130] sm:$0xff]  ;;  %v4646_v52 = vld [vmem:[%s5994_s1 + $0x128] sm:$0xff] }
  0x10   :  { %328 = vmatpush.bf16.msra.mxu2 %v4627_v14  ;;  %v4674_v43 = vld [vmem:[%s5994_s1 + $0x1f8] sm:$0xff]  ;;  %v4655_v49 = vld [vmem:[%s5994_s1 + $0x170] sm:$0xff]  ;;  %v4654_v53 = vld [vmem:[%s5994_s1 + $0x168] sm:$0xff] }
  0x11   :  { %342 = vmatpush.bf16.msra.mxu3 %v4635_v15  ;;  %v4665_v50 = vld [vmem:[%s5994_s1 + $0x1b0] sm:$0xff]  ;;  %v4664_v54 = vld [vmem:[%s5994_s1 + $0x1a8] sm:$0xff]  ;;  %v4645_v56 = vld [vmem:[%s5994_s1 + $0x120] sm:$0xff] }
  0x12   :  { %157 = vmatpush.bf16.msra.mxu0 %v4608_v16  ;;  %v4673_v51 = vld [vmem:[%s5994_s1 + $0x1f0] sm:$0xff]  ;;  %v4672_v55 = vld [vmem:[%s5994_s1 + $0x1e8] sm:$0xff]  ;;  %v4653_v57 = vld [vmem:[%s5994_s1 + $0x160] sm:$0xff] }
  0x13   :  { %171 = vmatpush.bf16.msra.mxu1 %v4616_v17  ;;  %v4663_v58 = vld [vmem:[%s5994_s1 + $0x1a0] sm:$0xff]  ;;  %v4644_v60 = vld [vmem:[%s5994_s1 + $0x118] sm:$0xff]  ;;  %v4643_v0 = vld [vmem:[%s5994_s1 + $0x110] sm:$0xff] }
  0x14   :  { %329 = vmatpush.bf16.msra.mxu2 %v4626_v18  ;;  %v4671_v59 = vld [vmem:[%s5994_s1 + $0x1e0] sm:$0xff]  ;;  %v4652_v61 = vld [vmem:[%s5994_s1 + $0x158] sm:$0xff]  ;;  %v4651_v1 = vld [vmem:[%s5994_s1 + $0x150] sm:$0xff] }
  0x15   :  { %343 = vmatpush.bf16.msra.mxu3 %v4634_v19  ;;  %v4662_v62 = vld [vmem:[%s5994_s1 + $0x198] sm:$0xff]  ;;  %v4661_v2 = vld [vmem:[%s5994_s1 + $0x190] sm:$0xff]  ;;  %v4642_v4 = vld [vmem:[%s5994_s1 + $0x108] sm:$0xff] }
  0x16   :  { %158 = vmatpush.bf16.msra.mxu0 %v4607_v20  ;;  %v4670_v63 = vld [vmem:[%s5994_s1 + $0x1d8] sm:$0xff]  ;;  %v4669_v3 = vld [vmem:[%s5994_s1 + $0x1d0] sm:$0xff]  ;;  %v4650_v5 = vld [vmem:[%s5994_s1 + $0x148] sm:$0xff] }
  0x17   :  { %172 = vmatpush.bf16.msra.mxu1 %v4615_v21  ;;  %v4660_v6 = vld [vmem:[%s5994_s1 + $0x188] sm:$0xff]  ;;  %v4641_v8 = vld [vmem:[%s5994_s1 + $0x100] sm:$0xff]  ;;  %v4684_v12 = vld [vmem:[%s5994_s1 + $0x238] sm:$0xff] }
  0x18   :  { %330 = vmatpush.bf16.msra.mxu2 %v4625_v22  ;;  %v4668_v7 = vld [vmem:[%s5994_s1 + $0x1c8] sm:$0xff]  ;;  %v4649_v9 = vld [vmem:[%s5994_s1 + $0x140] sm:$0xff]  ;;  %v4692_v13 = vld [vmem:[%s5994_s1 + $0x278] sm:$0xff] }
  0x19   :  { %344 = vmatpush.bf16.msra.mxu3 %v4633_v23  ;;  %v4659_v10 = vld [vmem:[%s5994_s1 + $0x180] sm:$0xff]  ;;  %v4640_v15 = vld [vmem:[%s5995_s0 + $0x64] sm:$0xf0]  ;;  %v3180_v17 = vld [vmem:[%s5995_s0 + $0x68] sm:$0xf0] }
  0x1a   :  { %159 = vmatpush.bf16.msra.mxu0 %v4606_v24  ;;  %v4667_v11 = vld [vmem:[%s5994_s1 + $0x1c0] sm:$0xff]  ;;  %v3284_v18 = vld [vmem:[%s5995_s0 + $0x90] sm:$0xf]  ;;  %v4658_v19 = vld [vmem:[%s5995_s0 + $0x94] sm:$0xf0] }
  0x1b   :  { %173 = vmatpush.bf16.msra.mxu1 %v4614_v25  ;;  %v3178_v14 = vld [vmem:[%s5995_s0 + $0x60] sm:$0xf]  ;;  %v4639_v16 = vld [vmem:[%s5995_s0 + $0x64] sm:$0xf]  ;;  %v4657_v20 = vld [vmem:[%s5995_s0 + $0x94] sm:$0xf] }
  0x1c   :  { %331 = vmatpush.bf16.msra.mxu2 %v4624_v26  ;;  %v3286_v21 = vld [vmem:[%s5995_s0 + $0x98] sm:$0xf0]  ;;  %v3179_v24 = vor.u32 %v4640_v15, %v3178_v14  ;;  %v3183_v25 = vor.u32 %v4639_v16, %v3180_v17  ;;  %v3285_v26 = vor.u32 %v4658_v19, %v3284_v18  ;;  %v4700_v34 = vld [vmem:[%s5994_s1 + $0x2a8] sm:$0xff]  ;;  %v4681_v36 = vld [vmem:[%s5994_s1 + $0x220] sm:$0xff] }
  0x1d   :  { %345 = vmatpush.bf16.msra.mxu3 %v4632_v27  ;;  %v4702_v22 = vld [vmem:[%s5994_s1 + $0x2b8] sm:$0xff]  ;;  %v3289_v27 = vor.u32 %v4657_v20, %v3286_v21  ;;  %v4708_v35 = vld [vmem:[%s5994_s1 + $0x2e8] sm:$0xff]  ;;  %v4689_v37 = vld [vmem:[%s5994_s1 + $0x260] sm:$0xff] }
  0x1e   :  { %160 = vmatpush.bf16.msra.mxu0 %v4605_v28  ;;  %v4710_v23 = vld [vmem:[%s5994_s1 + $0x2f8] sm:$0xff]  ;;  %v4683_v28 = vld [vmem:[%s5994_s1 + $0x230] sm:$0xff]  ;;  %v4699_v38 = vld [vmem:[%s5994_s1 + $0x2a0] sm:$0xff] }
  0x1f   :  { %174 = vmatpush.bf16.msra.mxu1 %v4613_v29  ;;  %v4691_v29 = vld [vmem:[%s5994_s1 + $0x270] sm:$0xff]  ;;  %v4707_v39 = vld [vmem:[%s5994_s1 + $0x2e0] sm:$0xff]  ;;  %v4680_v40 = vld [vmem:[%s5994_s1 + $0x218] sm:$0xff] }
  0x20   :  { %332 = vmatpush.bf16.msra.mxu2 %v4623_v30  ;;  %v4701_v30 = vld [vmem:[%s5994_s1 + $0x2b0] sm:$0xff]  ;;  %v4688_v41 = vld [vmem:[%s5994_s1 + $0x258] sm:$0xff]  ;;  %v4703_v14 = vld [vmem:[%s5994_s1 + $0x2c0] sm:$0xff] }
  0x21   :  { %346 = vmatpush.bf16.msra.mxu3 %v4631_v31  ;;  %161 = vmatmul.bf16.vlgmr.msra.gmra.mxu0 %v2967_v44  ;;  %v4709_v31 = vld [vmem:[%s5994_s1 + $0x2f0] sm:$0xff]  ;;  %v4720_v18 = vld [vmem:[%s5994_s1 + $0x338] sm:$0xff] }
  0x22   :  { %501 = vmatpush.bf16.msrb.mxu0 %v4648_v32  ;;  %175 = vmatmul.bf16.vlgmr.msra.gmra.mxu1 %v2971_v45  ;;  %v4682_v32 = vld [vmem:[%s5994_s1 + $0x228] sm:$0xff]  ;;  %v713_v44 = vld [vmem:[%s5995_s0 + $0x10] sm:$0x33]  ;;  %v3460_v45 = vld [vmem:[%s5995_s0 + $0x40] sm:$0x33] }
  0x23   :  { %515 = vmatpush.bf16.msrb.mxu1 %v4656_v33  ;;  %333 = vmatmul.bf16.vlgmr.msra.gmra.mxu2 %v3073_v46  ;;  %v4690_v33 = vld [vmem:[%s5994_s1 + $0x268] sm:$0xff]  ;;  %v4679_v46 = vld [vmem:[%s5994_s1 + $0x210] sm:$0xff]  ;;  %v4728_v19 = vld [vmem:[%s5994_s1 + $0x378] sm:$0xff] }
  0x24   :  { %677 = vmatpush.bf16.msrb.mxu2 %v4666_v42  ;;  %347 = vmatmul.bf16.vlgmr.msra.gmra.mxu3 %v3077_v47  ;;  %v4698_v42 = vld [vmem:[%s5994_s1 + $0x298] sm:$0xff]  ;;  %v4687_v47 = vld [vmem:[%s5994_s1 + $0x250] sm:$0xff] }
  0x25   :  { %691 = vmatpush.bf16.msrb.mxu3 %v4674_v43  ;;  %v4706_v43 = vld [vmem:[%s5994_s1 + $0x2d8] sm:$0xff] }
  0x26   :  { %502 = vmatpush.bf16.msrb.mxu0 %v4647_v48  ;;  %v4697_v48 = vld [vmem:[%s5994_s1 + $0x290] sm:$0xff] }
  0x27   :  { %516 = vmatpush.bf16.msrb.mxu1 %v4655_v49  ;;  %v754_v49 = vunpack.c.l.b16 %v713_v44 }
  0x28   :  { %678 = vmatpush.bf16.msrb.mxu2 %v4665_v50  ;;  %v4705_v50 = vld [vmem:[%s5994_s1 + $0x2d0] sm:$0xff] }
  0x29   :  { %692 = vmatpush.bf16.msrb.mxu3 %v4673_v51  ;;  %v3388_v51 = vld [vmem:[%s5995_s0] sm:$0xc] }
  0x2a   :  { %503 = vmatpush.bf16.msrb.mxu0 %v4646_v52  ;;  %v4676_v52 = vld [vmem:[%s5995_s0 + $0x4] sm:$0xf0] }
  0x2b   :  { %517 = vmatpush.bf16.msrb.mxu1 %v4654_v53  ;;  %v755_v53 = vunpack.c.h.b16 %v713_v44  ;;  %v4734_v44 = vld [vmem:[%s5994_s1 + $0x398] sm:$0xff] }
  0x2c   :  { %679 = vmatpush.bf16.msrb.mxu2 %v4664_v54  ;;  %v4675_v54 = vld [vmem:[%s5995_s0 + $0x4] sm:$0xc] }
  0x2d   :  { %693 = vmatpush.bf16.msrb.mxu3 %v4672_v55  ;;  %v3390_v55 = vld [vmem:[%s5995_s0 + $0x8] sm:$0xf0] }
  0x2e   :  { %504 = vmatpush.bf16.msrb.mxu0 %v4645_v56  ;;  %v3495_v56 = vld [vmem:[%s5995_s0 + $0x30] sm:$0xc] }
  0x2f   :  { %518 = vmatpush.bf16.msrb.mxu1 %v4653_v57  ;;  %v942_v57 = vunpack.c.l.b16 %v3460_v45 }
  0x30   :  { %680 = vmatpush.bf16.msrb.mxu2 %v4663_v58  ;;  %v943_v58 = vunpack.c.h.b16 %v3460_v45  ;;  %v4742_v45 = vld [vmem:[%s5994_s1 + $0x3d8] sm:$0xff] }
  0x31   :  { %694 = vmatpush.bf16.msrb.mxu3 %v4671_v59  ;;  %v4694_v59 = vld [vmem:[%s5995_s0 + $0x34] sm:$0xf0] }
  0x32   :  { %505 = vmatpush.bf16.msrb.mxu0 %v4644_v60  ;;  %v4693_v60 = vld [vmem:[%s5995_s0 + $0x34] sm:$0xc] }
  0x33   :  { %519 = vmatpush.bf16.msrb.mxu1 %v4652_v61  ;;  %v3497_v61 = vld [vmem:[%s5995_s0 + $0x38] sm:$0xf0] }
  0x34   :  { %681 = vmatpush.bf16.msrb.mxu2 %v4662_v62  ;;  %v4678_v62 = vld [vmem:[%s5994_s1 + $0x208] sm:$0xff] }
  0x35   :  { %695 = vmatpush.bf16.msrb.mxu3 %v4670_v63  ;;  %v4686_v63 = vld [vmem:[%s5994_s1 + $0x248] sm:$0xff] }
  0x36   :  { %506 = vmatpush.bf16.msrb.mxu0 %v4643_v0  ;;  %v758_v0 = vpack.c.b16 %v754_v49, %v754_v49  ;;  %v4723_v49 = vld [vmem:[%s5994_s1 + $0x350] sm:$0xff] }
  0x37   :  { %520 = vmatpush.bf16.msrb.mxu1 %v4651_v1  ;;  %v4696_v1 = vld [vmem:[%s5994_s1 + $0x288] sm:$0xff] }
  0x38   :  { %682 = vmatpush.bf16.msrb.mxu2 %v4661_v2  ;;  %v4704_v2 = vld [vmem:[%s5994_s1 + $0x2c8] sm:$0xff] }
  0x39   :  { %696 = vmatpush.bf16.msrb.mxu3 %v4669_v3  ;;  %v3389_v3 = vor.u32 %v4676_v52, %v3388_v51  ;;  %v4741_v52 = vld [vmem:[%s5994_s1 + $0x3d0] sm:$0xff] }
  0x3a   :  { %507 = vmatpush.bf16.msrb.mxu0 %v4642_v4  ;;  %v3393_v4 = vor.u32 %v4675_v54, %v3390_v55  ;;  %v4712_v54 = vld [vmem:[%s5995_s0 + $0x64] sm:$0xf0] }
  0x3b   :  { %521 = vmatpush.bf16.msrb.mxu1 %v4650_v5  ;;  %v759_v5 = vpack.c.b16 %v755_v53, %v755_v53  ;;  %v761_v15 = vrot.slane %v3389_v3, 2  ;;  %v3602_v53 = vld [vmem:[%s5995_s0 + $0x60] sm:$0xc]  ;;  %v4732_v3 = vld [vmem:[%s5994_s1 + $0x388] sm:$0xff] }
  0x3c   :  { %683 = vmatpush.bf16.msrb.mxu2 %v4660_v6  ;;  %v3496_v6 = vor.u32 %v4694_v59, %v3495_v56  ;;  %v764_v16 = vrot.slane %v3393_v4, 2  ;;  %v4711_v56 = vld [vmem:[%s5995_s0 + $0x64] sm:$0xc]  ;;  %v4740_v4 = vld [vmem:[%s5994_s1 + $0x3c8] sm:$0xff] }
  0x3d   :  { %697 = vmatpush.bf16.msrb.mxu3 %v4668_v7  ;;  %v946_v7 = vpack.c.b16 %v942_v57, %v942_v57  ;;  %v765_v17 = vrot.slane %v759_v5, 2  ;;  %v3604_v57 = vld [vmem:[%s5995_s0 + $0x68] sm:$0xf0]  ;;  %v3603_v5 = vor.u32 %v4712_v54, %v3602_v53 }
  0x3e   :  { %508 = vmatpush.bf16.msrb.mxu0 %v4641_v8  ;;  %v3500_v8 = vor.u32 %v4693_v60, %v3497_v61  ;;  %v948_v20 = vrot.slane %v3496_v6, 2  ;;  %v4730_v61 = vld [vmem:[%s5995_s0 + $0x94] sm:$0xf0]  ;;  %v3607_v6 = vor.u32 %v4711_v56, %v3604_v57  ;;  %v4758_v53 = vld [vmem:[%s5994_s1 + $0x48] sm:$0xff]  ;;  %v4749_v56 = vld [vmem:[%s5994_s1] sm:$0xff] }
  0x3f   :  { %522 = vmatpush.bf16.msrb.mxu1 %v4649_v9  ;;  %v947_v9 = vpack.c.b16 %v943_v58, %v943_v58  ;;  %v949_v21 = vrot.slane %v946_v7, 2  ;;  %v3709_v58 = vld [vmem:[%s5995_s0 + $0x90] sm:$0xc]  ;;  %v4768_v54 = vld [vmem:[%s5994_s1 + $0x88] sm:$0xff]  ;;  %v4757_v57 = vld [vmem:[%s5994_s1 + $0x40] sm:$0xff] }
  0x40   :  { %684 = vmatpush.bf16.msrb.mxu2 %v4659_v10  ;;  %v4677_v10 = vld [vmem:[%s5994_s1 + $0x200] sm:$0xff] }
  0x41   :  { %698 = vmatpush.bf16.msrb.mxu3 %v4667_v11  ;;  %509 = vmatmul.bf16.vlgmr.msrb.gmra.mxu0 %v3179_v24  ;;  %v4685_v11 = vld [vmem:[%s5994_s1 + $0x240] sm:$0xff]  ;;  %v4738_v24 = vld [vmem:[%s5994_s1 + $0x3b8] sm:$0xff] }
  0x42   :  { %865 = vmatpush.bf16.msra.mxu0 %v4684_v12  ;;  %523 = vmatmul.bf16.vlgmr.msrb.gmra.mxu1 %v3183_v25  ;;  %v762_v12 = vrot.slane %v758_v0, 2  ;;  %v4746_v25 = vld [vmem:[%s5994_s1 + $0x3f8] sm:$0xff]  ;;  %v4714_v0 = vld [vmem:[%s5994_s1 + $0x308] sm:$0xff] }
  0x43   :  { %879 = vmatpush.bf16.msra.mxu1 %v4692_v13  ;;  %685 = vmatmul.bf16.vlgmr.msrb.gmra.mxu2 %v3285_v26  ;;  %v4695_v13 = vld [vmem:[%s5994_s1 + $0x280] sm:$0xff] }
  0x44   :  { %1052 = vmatpush.bf16.msra.mxu2 %v4702_v22  ;;  %699 = vmatmul.bf16.vlgmr.msrb.gmra.mxu3 %v3289_v27  ;;  %v951_v22 = vrot.slane %v3500_v8, 2  ;;  %v763_v26 = vsel %vm760_vm0, %v761_v15, %v762_v12  ;;  %v766_v27 = vsel %vm760_vm0, %v764_v16, %v765_v17  ;;  %v3710_v8 = vor.u32 %v4730_v61, %v3709_v58  ;;  %v4713_v12 = vld [vmem:[%s5994_s1 + $0x300] sm:$0xff]  ;;  %v4800_v61 = vld [vmem:[%s5994_s1 + $0x178] sm:$0xff] }
  0x45   :  { %1066 = vmatpush.bf16.msra.mxu3 %v4710_v23  ;;  %v952_v23 = vrot.slane %v947_v9, 2  ;;  %v4739_v15 = vld [vmem:[%s5994_s1 + $0x3c0] sm:$0xff]  ;;  %v1135_v16 = vrot.slane %v3603_v5, 2  ;;  %v3891_v5 = vld [vmem:[%s5995_s0 + $0x50] sm:$0xf0] }
  0x46   :  { %866 = vmatpush.bf16.msra.mxu0 %v4683_v28  ;;  %v950_v28 = vsel %vm760_vm0, %v948_v20, %v949_v21  ;;  %v4756_v20 = vld [vmem:[%s5994_s1 + $0x38] sm:$0xff]  ;;  %v4767_v58 = vld [vmem:[%s5994_s1 + $0x80] sm:$0xff] }
  0x47   :  { %880 = vmatpush.bf16.msra.mxu1 %v4691_v29  ;;  %v953_v29 = vsel %vm760_vm0, %v951_v22, %v952_v23  ;;  %v4764_v21 = vld [vmem:[%s5994_s1 + $0x78] sm:$0xff]  ;;  %v1322_v22 = vrot.slane %v3710_v8, 2 }
  0x48   :  { %1053 = vmatpush.bf16.msra.mxu2 %v4701_v30  ;;  %v4719_v30 = vld [vmem:[%s5994_s1 + $0x330] sm:$0xff] }
  0x49   :  { %1067 = vmatpush.bf16.msra.mxu3 %v4709_v31  ;;  %v4727_v31 = vld [vmem:[%s5994_s1 + $0x370] sm:$0xff] }
  0x4a   :  { %867 = vmatpush.bf16.msra.mxu0 %v4682_v32  ;;  %v4737_v32 = vld [vmem:[%s5994_s1 + $0x3b0] sm:$0xff] }
  0x4b   :  { %881 = vmatpush.bf16.msra.mxu1 %v4690_v33  ;;  %v4745_v33 = vld [vmem:[%s5994_s1 + $0x3f0] sm:$0xff] }
  0x4c   :  { %1054 = vmatpush.bf16.msra.mxu2 %v4700_v34  ;;  %v4718_v34 = vld [vmem:[%s5994_s1 + $0x328] sm:$0xff] }
  0x4d   :  { %1068 = vmatpush.bf16.msra.mxu3 %v4708_v35  ;;  %v4726_v35 = vld [vmem:[%s5994_s1 + $0x368] sm:$0xff] }
  0x4e   :  { %868 = vmatpush.bf16.msra.mxu0 %v4681_v36  ;;  %v4736_v36 = vld [vmem:[%s5994_s1 + $0x3a8] sm:$0xff] }
  0x4f   :  { %882 = vmatpush.bf16.msra.mxu1 %v4689_v37  ;;  %v4744_v37 = vld [vmem:[%s5994_s1 + $0x3e8] sm:$0xff] }
  0x50   :  { %1055 = vmatpush.bf16.msra.mxu2 %v4699_v38  ;;  %v4717_v38 = vld [vmem:[%s5994_s1 + $0x320] sm:$0xff] }
  0x51   :  { %1069 = vmatpush.bf16.msra.mxu3 %v4707_v39  ;;  %v4725_v39 = vld [vmem:[%s5994_s1 + $0x360] sm:$0xff] }
  0x52   :  { %869 = vmatpush.bf16.msra.mxu0 %v4680_v40  ;;  %v4735_v40 = vld [vmem:[%s5994_s1 + $0x3a0] sm:$0xff] }
  0x53   :  { %883 = vmatpush.bf16.msra.mxu1 %v4688_v41  ;;  %v4743_v41 = vld [vmem:[%s5994_s1 + $0x3e0] sm:$0xff] }
  0x54   :  { %1056 = vmatpush.bf16.msra.mxu2 %v4698_v42  ;;  %v4716_v42 = vld [vmem:[%s5994_s1 + $0x318] sm:$0xff] }
  0x55   :  { %1070 = vmatpush.bf16.msra.mxu3 %v4706_v43  ;;  %v4724_v43 = vld [vmem:[%s5994_s1 + $0x358] sm:$0xff] }
  0x56   :  { %870 = vmatpush.bf16.msra.mxu0 %v4679_v46  ;;  %v3567_v46 = vld [vmem:[%s5995_s0 + $0x70] sm:$0x33] }
  0x57   :  { %884 = vmatpush.bf16.msra.mxu1 %v4687_v47  ;;  %v3674_v47 = vld [vmem:[%s5995_s0 + $0xa0] sm:$0x33]  ;;  %v1129_v51 = vunpack.c.l.b16 %v3567_v46  ;;  %v1130_v55 = vunpack.c.h.b16 %v3567_v46  ;;  %v4770_v46 = vld [vmem:[%s5994_s1 + $0x98] sm:$0xff] }
  0x58   :  { %1057 = vmatpush.bf16.msra.mxu2 %v4697_v48  ;;  %v4715_v48 = vld [vmem:[%s5994_s1 + $0x310] sm:$0xff]  ;;  %v1316_v59 = vunpack.c.l.b16 %v3674_v47  ;;  %v1317_v60 = vunpack.c.h.b16 %v3674_v47  ;;  %v4778_v47 = vld [vmem:[%s5994_s1 + $0xd8] sm:$0xff] }
  0x59   :  { %1071 = vmatpush.bf16.msra.mxu3 %v4705_v50  ;;  %v4733_v50 = vld [vmem:[%s5994_s1 + $0x390] sm:$0xff]  ;;  %v1134_v7 = vpack.c.b16 %v1130_v55, %v1130_v55  ;;  %v4776_v55 = vld [vmem:[%s5994_s1 + $0xc8] sm:$0xff] }
  0x5a   :  { %871 = vmatpush.bf16.msra.mxu0 %v4678_v62  ;;  %v4729_v62 = vld [vmem:[%s5995_s0 + $0x94] sm:$0xc]  ;;  %v1320_v9 = vpack.c.b16 %v1316_v59, %v1316_v59  ;;  %v4775_v59 = vld [vmem:[%s5994_s1 + $0xc0] sm:$0xff] }
  0x5b   :  { %885 = vmatpush.bf16.msra.mxu1 %v4686_v63  ;;  %v3711_v63 = vld [vmem:[%s5995_s0 + $0x98] sm:$0xf0] }
  0x5c   :  { %1058 = vmatpush.bf16.msra.mxu2 %v4696_v1  ;;  %v4722_v1 = vld [vmem:[%s5994_s1 + $0x348] sm:$0xff]  ;;  %v1323_v23 = vrot.slane %v1320_v9, 2 }
  0x5d   :  { %1072 = vmatpush.bf16.msra.mxu3 %v4704_v2  ;;  %v1133_v2 = vpack.c.b16 %v1129_v51, %v1129_v51  ;;  %v4777_v51 = vld [vmem:[%s5994_s1 + $0xd0] sm:$0xff] }
  0x5e   :  { %872 = vmatpush.bf16.msra.mxu0 %v4677_v10  ;;  %v3714_v10 = vor.u32 %v4729_v62, %v3711_v63  ;;  %v3783_v62 = vld [vmem:[%s5995_s0 + $0x18] sm:$0xf]  ;;  %v4748_v63 = vld [vmem:[%s5995_s0 + $0x1c] sm:$0xf0] }
  0x5f   :  { %886 = vmatpush.bf16.msra.mxu1 %v4685_v11  ;;  %v1321_v11 = vpack.c.b16 %v1317_v60, %v1317_v60  ;;  %v1136_v17 = vrot.slane %v1133_v2, 2  ;;  %v4792_v60 = vld [vmem:[%s5994_s1 + $0x138] sm:$0xff]  ;;  %v3889_v2 = vld [vmem:[%s5995_s0 + $0x48] sm:$0xf]  ;;  %v3784_v8 = vor.u32 %v4748_v63, %v3783_v62 }
  0x60   :  { %1059 = vmatpush.bf16.msra.mxu2 %v4695_v13  ;;  %v4721_v13 = vld [vmem:[%s5994_s1 + $0x340] sm:$0xff]  ;;  %v4844_v62 = vld [vmem:[%s5994_s1 + $0x2a8] sm:$0xff] }
  0x61   :  { %1073 = vmatpush.bf16.msra.mxu3 %v4703_v14  ;;  %873 = vmatmul.bf16.vlgmr.msra.gmra.mxu0 %v763_v26  ;;  %v4731_v14 = vld [vmem:[%s5994_s1 + $0x380] sm:$0xff]  ;;  %v4774_v26 = vld [vmem:[%s5994_s1 + $0xb8] sm:$0xff]  ;;  %v4852_v63 = vld [vmem:[%s5994_s1 + $0x2e8] sm:$0xff] }
  0x62   :  { %1239 = vmatpush.bf16.msrb.mxu0 %v4720_v18  ;;  %887 = vmatmul.bf16.vlgmr.msra.gmra.mxu1 %v766_v27  ;;  %v1138_v18 = vrot.slane %v3607_v6, 2  ;;  %v4782_v27 = vld [vmem:[%s5994_s1 + $0xf8] sm:$0xff] }
  0x63   :  { %1253 = vmatpush.bf16.msrb.mxu1 %v4728_v19  ;;  %1060 = vmatmul.bf16.vlgmr.msra.gmra.mxu2 %v950_v28  ;;  %v1139_v19 = vrot.slane %v1134_v7, 2  ;;  %v1137_v28 = vsel %vm760_vm0, %v1135_v16, %v1136_v17  ;;  %v4810_v6 = vld [vmem:[%s5994_s1 + $0x1b8] sm:$0xff]  ;;  %v4790_v16 = vld [vmem:[%s5994_s1 + $0x128] sm:$0xff] }
  0x64   :  { %1426 = vmatpush.bf16.msrb.mxu2 %v4738_v24  ;;  %1074 = vmatmul.bf16.vlgmr.msra.gmra.mxu3 %v953_v29  ;;  %v1325_v24 = vrot.slane %v3714_v10, 2  ;;  %v4818_v7 = vld [vmem:[%s5994_s1 + $0x1f8] sm:$0xff]  ;;  %v4798_v17 = vld [vmem:[%s5994_s1 + $0x168] sm:$0xff] }
  0x65   :  { %1440 = vmatpush.bf16.msrb.mxu3 %v4746_v25  ;;  %v1326_v25 = vrot.slane %v1321_v11, 2  ;;  %v1140_v29 = vsel %vm760_vm0, %v1138_v18, %v1139_v19  ;;  %v4808_v18 = vld [vmem:[%s5994_s1 + $0x1a8] sm:$0xff] }
  0x66   :  { %1240 = vmatpush.bf16.msrb.mxu0 %v4719_v30  ;;  %v1324_v30 = vsel %vm760_vm0, %v1322_v22, %v1323_v23  ;;  %v4816_v19 = vld [vmem:[%s5994_s1 + $0x1e8] sm:$0xff]  ;;  %v4807_v22 = vld [vmem:[%s5994_s1 + $0x1a0] sm:$0xff] }
  0x67   :  { %1254 = vmatpush.bf16.msrb.mxu1 %v4727_v31  ;;  %v1327_v31 = vsel %vm760_vm0, %v1325_v24, %v1326_v25  ;;  %v4815_v23 = vld [vmem:[%s5994_s1 + $0x1e0] sm:$0xff]  ;;  %v4788_v24 = vld [vmem:[%s5994_s1 + $0x118] sm:$0xff] }
  0x68   :  { %1427 = vmatpush.bf16.msrb.mxu2 %v4737_v32  ;;  %v4755_v32 = vld [vmem:[%s5994_s1 + $0x30] sm:$0xff]  ;;  %v4796_v25 = vld [vmem:[%s5994_s1 + $0x158] sm:$0xff] }
  0x69   :  { %1441 = vmatpush.bf16.msrb.mxu3 %v4745_v33  ;;  %v4763_v33 = vld [vmem:[%s5994_s1 + $0x70] sm:$0xff] }
  0x6a   :  { %1241 = vmatpush.bf16.msrb.mxu0 %v4718_v34  ;;  %v4773_v34 = vld [vmem:[%s5994_s1 + $0xb0] sm:$0xff] }
  0x6b   :  { %1255 = vmatpush.bf16.msrb.mxu1 %v4726_v35  ;;  %v4781_v35 = vld [vmem:[%s5994_s1 + $0xf0] sm:$0xff] }
  0x6c   :  { %1428 = vmatpush.bf16.msrb.mxu2 %v4736_v36  ;;  %v4754_v36 = vld [vmem:[%s5994_s1 + $0x28] sm:$0xff] }
  0x6d   :  { %1442 = vmatpush.bf16.msrb.mxu3 %v4744_v37  ;;  %v4762_v37 = vld [vmem:[%s5994_s1 + $0x68] sm:$0xff] }
  0x6e   :  { %1242 = vmatpush.bf16.msrb.mxu0 %v4717_v38  ;;  %v4772_v38 = vld [vmem:[%s5994_s1 + $0xa8] sm:$0xff] }
  0x6f   :  { %1256 = vmatpush.bf16.msrb.mxu1 %v4725_v39  ;;  %v4780_v39 = vld [vmem:[%s5994_s1 + $0xe8] sm:$0xff] }
  0x70   :  { %1429 = vmatpush.bf16.msrb.mxu2 %v4735_v40  ;;  %v4753_v40 = vld [vmem:[%s5994_s1 + $0x20] sm:$0xff] }
  0x71   :  { %1443 = vmatpush.bf16.msrb.mxu3 %v4743_v41  ;;  %v4761_v41 = vld [vmem:[%s5994_s1 + $0x60] sm:$0xff] }
  0x72   :  { %1243 = vmatpush.bf16.msrb.mxu0 %v4716_v42  ;;  %v4771_v42 = vld [vmem:[%s5994_s1 + $0xa0] sm:$0xff] }
  0x73   :  { %1257 = vmatpush.bf16.msrb.mxu1 %v4724_v43  ;;  %v4779_v43 = vld [vmem:[%s5994_s1 + $0xe0] sm:$0xff] }
  0x74   :  { %1430 = vmatpush.bf16.msrb.mxu2 %v4734_v44  ;;  %v4752_v44 = vld [vmem:[%s5994_s1 + $0x18] sm:$0xff] }
  0x75   :  { %1444 = vmatpush.bf16.msrb.mxu3 %v4742_v45  ;;  %v4760_v45 = vld [vmem:[%s5994_s1 + $0x58] sm:$0xff] }
  0x76   :  { %1244 = vmatpush.bf16.msrb.mxu0 %v4715_v48  ;;  %v4751_v48 = vld [vmem:[%s5994_s1 + $0x10] sm:$0xff] }
  0x77   :  { %1258 = vmatpush.bf16.msrb.mxu1 %v4723_v49  ;;  %v4759_v49 = vld [vmem:[%s5994_s1 + $0x50] sm:$0xff] }
  0x78   :  { %1431 = vmatpush.bf16.msrb.mxu2 %v4733_v50  ;;  %v4769_v50 = vld [vmem:[%s5994_s1 + $0x90] sm:$0xff] }
  0x79   :  { %1445 = vmatpush.bf16.msrb.mxu3 %v4741_v52  ;;  %v4750_v52 = vld [vmem:[%s5994_s1 + $0x8] sm:$0xff] }
  0x7a   :  { %1245 = vmatpush.bf16.msrb.mxu0 %v4714_v0  ;;  %v4747_v0 = vld [vmem:[%s5995_s0 + $0x1c] sm:$0xf] }
  0x7b   :  { %1259 = vmatpush.bf16.msrb.mxu1 %v4722_v1  ;;  %v3785_v1 = vld [vmem:[%s5995_s0 + $0x20] sm:$0xf0] }
  0x7c   :  { %1432 = vmatpush.bf16.msrb.mxu2 %v4732_v3  ;;  %v4766_v3 = vld [vmem:[%s5995_s0 + $0x4c] sm:$0xf0]  ;;  %v3788_v9 = vor.u32 %v4747_v0, %v3785_v1  ;;  %v4825_v0 = vld [vmem:[%s5994_s1 + $0x220] sm:$0xff] }
  0x7d   :  { %1446 = vmatpush.bf16.msrb.mxu3 %v4740_v4  ;;  %v4765_v4 = vld [vmem:[%s5995_s0 + $0x4c] sm:$0xf]  ;;  %v3890_v10 = vor.u32 %v4766_v3, %v3889_v2  ;;  %v4833_v1 = vld [vmem:[%s5994_s1 + $0x260] sm:$0xff] }
  0x7e   :  { %1246 = vmatpush.bf16.msrb.mxu0 %v4713_v12  ;;  %v3894_v11 = vor.u32 %v4765_v4, %v3891_v5  ;;  %v4791_v12 = vld [vmem:[%s5994_s1 + $0x130] sm:$0xff]  ;;  %v4843_v2 = vld [vmem:[%s5994_s1 + $0x2a0] sm:$0xff] }
  0x7f   :  { %1260 = vmatpush.bf16.msrb.mxu1 %v4721_v13  ;;  %v4799_v13 = vld [vmem:[%s5994_s1 + $0x170] sm:$0xff]  ;;  %v4851_v3 = vld [vmem:[%s5994_s1 + $0x2e0] sm:$0xff] }
  0x80   :  { %1433 = vmatpush.bf16.msrb.mxu2 %v4731_v14  ;;  %v4809_v14 = vld [vmem:[%s5994_s1 + $0x1b0] sm:$0xff] }
  0x81   :  { %1447 = vmatpush.bf16.msrb.mxu3 %v4739_v15  ;;  %1247 = vmatmul.bf16.vlgmr.msrb.gmra.mxu0 %v1137_v28  ;;  %v4817_v15 = vld [vmem:[%s5994_s1 + $0x1f0] sm:$0xff] }
  0x82   :  { %1628 = vmatpush.bf16.msra.mxu0 %v4756_v20  ;;  %1261 = vmatmul.bf16.vlgmr.msrb.gmra.mxu1 %v1140_v29  ;;  %v4789_v20 = vld [vmem:[%s5994_s1 + $0x120] sm:$0xff]  ;;  %v4787_v28 = vld [vmem:[%s5994_s1 + $0x110] sm:$0xff] }
  0x83   :  { %1642 = vmatpush.bf16.msra.mxu1 %v4764_v21  ;;  %1434 = vmatmul.bf16.vlgmr.msrb.gmra.mxu2 %v1324_v30  ;;  %v4797_v21 = vld [vmem:[%s5994_s1 + $0x160] sm:$0xff]  ;;  %v4795_v29 = vld [vmem:[%s5994_s1 + $0x150] sm:$0xff] }
  0x84   :  { %1799 = vmatpush.bf16.msra.mxu2 %v4774_v26  ;;  %1448 = vmatmul.bf16.vlgmr.msrb.gmra.mxu3 %v1327_v31  ;;  %v4806_v26 = vld [vmem:[%s5994_s1 + $0x198] sm:$0xff]  ;;  %v4805_v30 = vld [vmem:[%s5994_s1 + $0x190] sm:$0xff] }
  0x85   :  { %1813 = vmatpush.bf16.msra.mxu3 %v4782_v27  ;;  %v4814_v27 = vld [vmem:[%s5994_s1 + $0x1d8] sm:$0xff]  ;;  %v4813_v31 = vld [vmem:[%s5994_s1 + $0x1d0] sm:$0xff] }
  0x86   :  { %1629 = vmatpush.bf16.msra.mxu0 %v4755_v32  ;;  %v4786_v32 = vld [vmem:[%s5994_s1 + $0x108] sm:$0xff] }
  0x87   :  { %1643 = vmatpush.bf16.msra.mxu1 %v4763_v33  ;;  %v4794_v33 = vld [vmem:[%s5994_s1 + $0x148] sm:$0xff] }
  0x88   :  { %1800 = vmatpush.bf16.msra.mxu2 %v4773_v34  ;;  %v4804_v34 = vld [vmem:[%s5994_s1 + $0x188] sm:$0xff] }
  0x89   :  { %1814 = vmatpush.bf16.msra.mxu3 %v4781_v35  ;;  %v4812_v35 = vld [vmem:[%s5994_s1 + $0x1c8] sm:$0xff] }
  0x8a   :  { %1630 = vmatpush.bf16.msra.mxu0 %v4754_v36  ;;  %v4785_v36 = vld [vmem:[%s5994_s1 + $0x100] sm:$0xff] }
  0x8b   :  { %1644 = vmatpush.bf16.msra.mxu1 %v4762_v37  ;;  %v4793_v37 = vld [vmem:[%s5994_s1 + $0x140] sm:$0xff] }
  0x8c   :  { %1801 = vmatpush.bf16.msra.mxu2 %v4772_v38  ;;  %v4803_v38 = vld [vmem:[%s5994_s1 + $0x180] sm:$0xff] }
  0x8d   :  { %1815 = vmatpush.bf16.msra.mxu3 %v4780_v39  ;;  %v4811_v39 = vld [vmem:[%s5994_s1 + $0x1c0] sm:$0xff] }
  0x8e   :  { %1631 = vmatpush.bf16.msra.mxu0 %v4753_v40  ;;  %v4828_v40 = vld [vmem:[%s5994_s1 + $0x238] sm:$0xff] }
  0x8f   :  { %1645 = vmatpush.bf16.msra.mxu1 %v4761_v41  ;;  %v4836_v41 = vld [vmem:[%s5994_s1 + $0x278] sm:$0xff] }
  0x90   :  { %1802 = vmatpush.bf16.msra.mxu2 %v4771_v42  ;;  %v3995_v42 = vld [vmem:[%s5995_s0 + $0x78] sm:$0xf] }
  0x91   :  { %1816 = vmatpush.bf16.msra.mxu3 %v4779_v43  ;;  %v4784_v43 = vld [vmem:[%s5995_s0 + $0x7c] sm:$0xf0] }
  0x92   :  { %1632 = vmatpush.bf16.msra.mxu0 %v4752_v44  ;;  %v4783_v44 = vld [vmem:[%s5995_s0 + $0x7c] sm:$0xf] }
  0x93   :  { %1646 = vmatpush.bf16.msra.mxu1 %v4760_v45  ;;  %v3997_v45 = vld [vmem:[%s5995_s0 + $0x80] sm:$0xf0] }
  0x94   :  { %1803 = vmatpush.bf16.msra.mxu2 %v4770_v46  ;;  %v4101_v46 = vld [vmem:[%s5995_s0 + $0xa8] sm:$0xf] }
  0x95   :  { %1817 = vmatpush.bf16.msra.mxu3 %v4778_v47  ;;  %v4802_v47 = vld [vmem:[%s5995_s0 + $0xac] sm:$0xf0] }
  0x96   :  { %1633 = vmatpush.bf16.msra.mxu0 %v4751_v48  ;;  %v4801_v48 = vld [vmem:[%s5995_s0 + $0xac] sm:$0xf] }
  0x97   :  { %1647 = vmatpush.bf16.msra.mxu1 %v4759_v49  ;;  %v4103_v49 = vld [vmem:[%s5995_s0 + $0xb0] sm:$0xf0] }
  0x98   :  { %1804 = vmatpush.bf16.msra.mxu2 %v4769_v50  ;;  %v4846_v50 = vld [vmem:[%s5994_s1 + $0x2b8] sm:$0xff] }
  0x99   :  { %1818 = vmatpush.bf16.msra.mxu3 %v4777_v51  ;;  %v4854_v51 = vld [vmem:[%s5994_s1 + $0x2f8] sm:$0xff] }
  0x9a   :  { %1634 = vmatpush.bf16.msra.mxu0 %v4750_v52  ;;  %v3996_v52 = vor.u32 %v4784_v43, %v3995_v42 }
  0x9b   :  { %1648 = vmatpush.bf16.msra.mxu1 %v4758_v53  ;;  %v4000_v53 = vor.u32 %v4783_v44, %v3997_v45  ;;  %v4821_v44 = vld [vmem:[%s5994_s1 + $0x200] sm:$0xff] }
  0x9c   :  { %1805 = vmatpush.bf16.msra.mxu2 %v4768_v54  ;;  %v4102_v54 = vor.u32 %v4802_v47, %v4101_v46  ;;  %v4829_v45 = vld [vmem:[%s5994_s1 + $0x240] sm:$0xff] }
  0x9d   :  { %1819 = vmatpush.bf16.msra.mxu3 %v4776_v55  ;;  %v4106_v55 = vor.u32 %v4801_v48, %v4103_v49  ;;  %v4839_v46 = vld [vmem:[%s5994_s1 + $0x280] sm:$0xff] }
  0x9e   :  { %1635 = vmatpush.bf16.msra.mxu0 %v4749_v56  ;;  %v4827_v56 = vld [vmem:[%s5994_s1 + $0x230] sm:$0xff]  ;;  %v5710_v4 = vpop.f32.mrf.mxu0  ;;  %v4847_v47 = vld [vmem:[%s5994_s1 + $0x2c0] sm:$0xff] }
  0x9f   :  { %1649 = vmatpush.bf16.msra.mxu1 %v4757_v57  ;;  %v4835_v57 = vld [vmem:[%s5994_s1 + $0x270] sm:$0xff]  ;;  %v5712_v5 = vpop.f32.mrf.mxu1 }
  0xa0   :  { %1806 = vmatpush.bf16.msra.mxu2 %v4767_v58  ;;  %v4845_v58 = vld [vmem:[%s5994_s1 + $0x2b0] sm:$0xff] }
  0xa1   :  { %1820 = vmatpush.bf16.msra.mxu3 %v4775_v59  ;;  %1636 = vmatmul.bf16.vlgmr.msra.gmra.mxu0 %v3784_v8  ;;  %v4853_v59 = vld [vmem:[%s5994_s1 + $0x2f0] sm:$0xff]  ;;  %v4842_v8 = vld [vmem:[%s5994_s1 + $0x298] sm:$0xff] }
  0xa2   :  { %1974 = vmatpush.bf16.msrb.mxu0 %v4792_v60  ;;  %1650 = vmatmul.bf16.vlgmr.msra.gmra.mxu1 %v3788_v9  ;;  %v4826_v60 = vld [vmem:[%s5994_s1 + $0x228] sm:$0xff]  ;;  %v4850_v9 = vld [vmem:[%s5994_s1 + $0x2d8] sm:$0xff] }
  0xa3   :  { %1988 = vmatpush.bf16.msrb.mxu1 %v4800_v61  ;;  %1807 = vmatmul.bf16.vlgmr.msra.gmra.mxu2 %v3890_v10  ;;  %v4834_v61 = vld [vmem:[%s5994_s1 + $0x268] sm:$0xff] }
  0xa4   :  { %2149 = vmatpush.bf16.msrb.mxu2 %v4810_v6  ;;  %1821 = vmatmul.bf16.vlgmr.msra.gmra.mxu3 %v3894_v11  ;;  %v4824_v6 = vld [vmem:[%s5994_s1 + $0x218] sm:$0xff]  ;;  %v4173_v10 = vld [vmem:[%s5995_s0 + $0x28] sm:$0x33] }
  0xa5   :  { %2163 = vmatpush.bf16.msrb.mxu3 %v4818_v7  ;;  %v4832_v7 = vld [vmem:[%s5994_s1 + $0x258] sm:$0xff] }
  0xa6   :  { %1975 = vmatpush.bf16.msrb.mxu0 %v4791_v12  ;;  %v4280_v11 = vld [vmem:[%s5995_s0 + $0x58] sm:$0x33]  ;;  %v4823_v12 = vld [vmem:[%s5994_s1 + $0x210] sm:$0xff] }
  0xa7   :  { %1989 = vmatpush.bf16.msrb.mxu1 %v4799_v13  ;;  %v4831_v13 = vld [vmem:[%s5994_s1 + $0x250] sm:$0xff] }
  0xa8   :  { %2150 = vmatpush.bf16.msrb.mxu2 %v4809_v14  ;;  %v4841_v14 = vld [vmem:[%s5994_s1 + $0x290] sm:$0xff] }
  0xa9   :  { %2164 = vmatpush.bf16.msrb.mxu3 %v4817_v15  ;;  %v2225_v15 = vunpack.c.l.b16 %v4173_v10 }
  0xaa   :  { %1976 = vmatpush.bf16.msrb.mxu0 %v4790_v16  ;;  %v4849_v16 = vld [vmem:[%s5994_s1 + $0x2d0] sm:$0xff] }
  0xab   :  { %1990 = vmatpush.bf16.msrb.mxu1 %v4798_v17  ;;  %v4208_v17 = vld [vmem:[%s5995_s0 + $0x18] sm:$0xc] }
  0xac   :  { %2151 = vmatpush.bf16.msrb.mxu2 %v4808_v18  ;;  %v4820_v18 = vld [vmem:[%s5995_s0 + $0x1c] sm:$0xf0] }
  0xad   :  { %2165 = vmatpush.bf16.msrb.mxu3 %v4816_v19  ;;  %v2226_v19 = vunpack.c.h.b16 %v4173_v10  ;;  %v4862_v10 = vld [vmem:[%s5994_s1 + $0x328] sm:$0xff] }
  0xae   :  { %1977 = vmatpush.bf16.msrb.mxu0 %v4789_v20  ;;  %v5750_v20 = vpop.f32.mrf.mxu2 }
  0xaf   :  { %1991 = vmatpush.bf16.msrb.mxu1 %v4797_v21  ;;  %v5752_v21 = vpop.f32.mrf.mxu3 }
  0xb0   :  { %2152 = vmatpush.bf16.msrb.mxu2 %v4807_v22  ;;  %v4819_v22 = vld [vmem:[%s5995_s0 + $0x1c] sm:$0xc] }
  0xb1   :  { %2166 = vmatpush.bf16.msrb.mxu3 %v4815_v23  ;;  %v4210_v23 = vld [vmem:[%s5995_s0 + $0x20] sm:$0xf0] }
  0xb2   :  { %1978 = vmatpush.bf16.msrb.mxu0 %v4788_v24  ;;  %v4315_v24 = vld [vmem:[%s5995_s0 + $0x48] sm:$0xc] }
  0xb3   :  { %1992 = vmatpush.bf16.msrb.mxu1 %v4796_v25  ;;  %v2411_v25 = vunpack.c.l.b16 %v4280_v11 }
  0xb4   :  { %2153 = vmatpush.bf16.msrb.mxu2 %v4806_v26  ;;  %v2412_v26 = vunpack.c.h.b16 %v4280_v11  ;;  %v4870_v11 = vld [vmem:[%s5994_s1 + $0x368] sm:$0xff] }
  0xb5   :  { %2167 = vmatpush.bf16.msrb.mxu3 %v4814_v27  ;;  %v4838_v27 = vld [vmem:[%s5995_s0 + $0x4c] sm:$0xf0] }
  0xb6   :  { %1979 = vmatpush.bf16.msrb.mxu0 %v4787_v28  ;;  %v4837_v28 = vld [vmem:[%s5995_s0 + $0x4c] sm:$0xc]  ;;  %v2416_v43 = vpack.c.b16 %v2412_v26, %v2412_v26  ;;  %v4387_v26 = vld [vmem:[%s5995_s0 + $0x88] sm:$0x33] }
  0xb7   :  { %1993 = vmatpush.bf16.msrb.mxu1 %v4795_v29  ;;  %v4317_v29 = vld [vmem:[%s5995_s0 + $0x50] sm:$0xf0] }
  0xb8   :  { %2154 = vmatpush.bf16.msrb.mxu2 %v4805_v30  ;;  %v4822_v30 = vld [vmem:[%s5994_s1 + $0x208] sm:$0xff]  ;;  %v4320_v42 = vor.u32 %v4837_v28, %v4317_v29  ;;  %v4886_v28 = vld [vmem:[%s5994_s1 + $0x3d8] sm:$0xff] }
  0xb9   :  { %2168 = vmatpush.bf16.msrb.mxu3 %v4813_v31  ;;  %v4830_v31 = vld [vmem:[%s5994_s1 + $0x248] sm:$0xff]  ;;  %v4494_v29 = vld [vmem:[%s5995_s0 + $0xb8] sm:$0x33] }
  0xba   :  { %1980 = vmatpush.bf16.msrb.mxu0 %v4786_v32  ;;  %v2229_v32 = vpack.c.b16 %v2225_v15, %v2225_v15 }
  0xbb   :  { %1994 = vmatpush.bf16.msrb.mxu1 %v4794_v33  ;;  %v5778_v33 = vpop.f32.mrf.mxu0 }
  0xbc   :  { %2155 = vmatpush.bf16.msrb.mxu2 %v4804_v34  ;;  %v5780_v34 = vpop.f32.mrf.mxu1  ;;  %v2232_v49 = vrot.slane %v2229_v32, 2  ;;  %v4877_v32 = vld [vmem:[%s5994_s1 + $0x390] sm:$0xff] }
  0xbd   :  { %2169 = vmatpush.bf16.msrb.mxu3 %v4812_v35  ;;  %v4840_v35 = vld [vmem:[%s5994_s1 + $0x288] sm:$0xff] }
  0xbe   :  { %1981 = vmatpush.bf16.msrb.mxu0 %v4785_v36  ;;  %v4848_v36 = vld [vmem:[%s5994_s1 + $0x2c8] sm:$0xff] }
  0xbf   :  { %1995 = vmatpush.bf16.msrb.mxu1 %v4793_v37  ;;  %v4209_v37 = vor.u32 %v4820_v18, %v4208_v17  ;;  %v4869_v17 = vld [vmem:[%s5994_s1 + $0x360] sm:$0xff] }
  0xc0   :  { %2156 = vmatpush.bf16.msrb.mxu2 %v4803_v38  ;;  %v4213_v38 = vor.u32 %v4819_v22, %v4210_v23  ;;  %v4879_v18 = vld [vmem:[%s5994_s1 + $0x3a0] sm:$0xff] }
  0xc1   :  { %2170 = vmatpush.bf16.msrb.mxu3 %v4811_v39  ;;  %1982 = vmatmul.bf16.vlgmr.msrb.gmra.mxu0 %v3996_v52  ;;  %v2230_v39 = vpack.c.b16 %v2226_v19, %v2226_v19  ;;  %v2231_v48 = vrot.slane %v4209_v37, 2  ;;  %v4864_v52 = vld [vmem:[%s5994_s1 + $0x338] sm:$0xff]  ;;  %v4887_v19 = vld [vmem:[%s5994_s1 + $0x3e0] sm:$0xff] }
  0xc2   :  { %2335 = vmatpush.bf16.msra.mxu0 %v4828_v40  ;;  %1996 = vmatmul.bf16.vlgmr.msrb.gmra.mxu1 %v4000_v53  ;;  %v4316_v40 = vor.u32 %v4838_v27, %v4315_v24  ;;  %v4872_v53 = vld [vmem:[%s5994_s1 + $0x378] sm:$0xff] }
  0xc3   :  { %2349 = vmatpush.bf16.msra.mxu1 %v4836_v41  ;;  %2157 = vmatmul.bf16.vlgmr.msrb.gmra.mxu2 %v4102_v54  ;;  %v2415_v41 = vpack.c.b16 %v2411_v25, %v2411_v25  ;;  %v4860_v24 = vld [vmem:[%s5994_s1 + $0x318] sm:$0xff] }
  0xc4   :  { %2521 = vmatpush.bf16.msra.mxu2 %v4846_v50  ;;  %2171 = vmatmul.bf16.vlgmr.msrb.gmra.mxu3 %v4106_v55  ;;  %v2234_v50 = vrot.slane %v4213_v38, 2  ;;  %v2417_v54 = vrot.slane %v4316_v40, 2  ;;  %v4868_v25 = vld [vmem:[%s5994_s1 + $0x358] sm:$0xff]  ;;  %v4856_v38 = vld [vmem:[%s5995_s0 + $0x7c] sm:$0xf0]  ;;  %v2783_v40 = vunpack.c.l.b16 %v4494_v29 }
  0xc5   :  { %2535 = vmatpush.bf16.msra.mxu3 %v4854_v51  ;;  %v2235_v51 = vrot.slane %v2230_v39, 2  ;;  %v2418_v55 = vrot.slane %v2415_v41, 2  ;;  %v4878_v27 = vld [vmem:[%s5994_s1 + $0x398] sm:$0xff]  ;;  %v2598_v39 = vunpack.c.h.b16 %v4387_v26 }
  0xc6   :  { %2336 = vmatpush.bf16.msra.mxu0 %v4827_v56  ;;  %v2420_v56 = vrot.slane %v4320_v42, 2  ;;  %v4422_v37 = vld [vmem:[%s5995_s0 + $0x78] sm:$0xc]  ;;  %v4855_v41 = vld [vmem:[%s5995_s0 + $0x7c] sm:$0xc] }
  0xc7   :  { %2350 = vmatpush.bf16.msra.mxu1 %v4835_v57  ;;  %v2421_v57 = vrot.slane %v2416_v43, 2  ;;  %v4424_v42 = vld [vmem:[%s5995_s0 + $0x80] sm:$0xf0]  ;;  %v4529_v43 = vld [vmem:[%s5995_s0 + $0xa8] sm:$0xc] }
  0xc8   :  { %2522 = vmatpush.bf16.msra.mxu2 %v4845_v58  ;;  %v4882_v58 = vld [vmem:[%s5994_s1 + $0x3b8] sm:$0xff] }
  0xc9   :  { %2536 = vmatpush.bf16.msra.mxu3 %v4853_v59  ;;  %v4890_v59 = vld [vmem:[%s5994_s1 + $0x3f8] sm:$0xff] }
  0xca   :  { %2337 = vmatpush.bf16.msra.mxu0 %v4826_v60  ;;  %v5812_v60 = vpop.f32.mrf.mxu2 }
  0xcb   :  { %2351 = vmatpush.bf16.msra.mxu1 %v4834_v61  ;;  %v5814_v61 = vpop.f32.mrf.mxu3 }
  0xcc   :  { %2523 = vmatpush.bf16.msra.mxu2 %v4844_v62  ;;  %v2233_v62 = vsel %vm760_vm0, %v2231_v48, %v2232_v49  ;;  %v4873_v48 = vld [vmem:[%s5995_s0 + $0xac] sm:$0xc]  ;;  %v4531_v49 = vld [vmem:[%s5995_s0 + $0xb0] sm:$0xf0] }
  0xcd   :  { %2537 = vmatpush.bf16.msra.mxu3 %v4852_v63  ;;  %v2236_v63 = vsel %vm760_vm0, %v2234_v50, %v2235_v51 }
  0xce   :  { %2338 = vmatpush.bf16.msra.mxu0 %v4825_v0  ;;  %v2419_v0 = vsel %vm760_vm0, %v2417_v54, %v2418_v55  ;;  %v4858_v54 = vld [vmem:[%s5994_s1 + $0x308] sm:$0xff] }
  0xcf   :  { %2352 = vmatpush.bf16.msra.mxu1 %v4833_v1  ;;  %v2422_v1 = vsel %vm760_vm0, %v2420_v56, %v2421_v57  ;;  %v4866_v55 = vld [vmem:[%s5994_s1 + $0x348] sm:$0xff]  ;;  %v4427_v56 = vor.u32 %v4855_v41, %v4424_v42  ;;  %v2602_v57 = vpack.c.b16 %v2598_v39, %v2598_v39  ;;  %v179_v41 = vadd.f32 %v5780_v34, %v5778_v33 }
  0xd0   :  { %2524 = vmatpush.bf16.msra.mxu2 %v4843_v2  ;;  %v4863_v2 = vld [vmem:[%s5994_s1 + $0x330] sm:$0xff]  ;;  %v351_v42 = vadd.f32 %v5814_v61, %v5812_v60 }
  0xd1   :  { %2538 = vmatpush.bf16.msra.mxu3 %v4851_v3  ;;  %v4871_v3 = vld [vmem:[%s5994_s1 + $0x370] sm:$0xff] }
  0xd2   :  { %2339 = vmatpush.bf16.msra.mxu0 %v4824_v6  ;;  %v5826_v6 = vpop.f32.mrf.mxu0 }
  0xd3   :  { %2353 = vmatpush.bf16.msra.mxu1 %v4832_v7  ;;  %v5828_v7 = vpop.f32.mrf.mxu1  ;;  %v5850_v15 = vpop.f32.mrf.mxu3 }
  0xd4   :  { %2525 = vmatpush.bf16.msra.mxu2 %v4842_v8  ;;  %v4881_v8 = vld [vmem:[%s5994_s1 + $0x3b0] sm:$0xff] }
  0xd5   :  { %2539 = vmatpush.bf16.msra.mxu3 %v4850_v9  ;;  %v4889_v9 = vld [vmem:[%s5994_s1 + $0x3f0] sm:$0xff] }
  0xd6   :  { %2340 = vmatpush.bf16.msra.mxu0 %v4823_v12  ;;  %v4880_v12 = vld [vmem:[%s5994_s1 + $0x3a8] sm:$0xff] }
  0xd7   :  { %2354 = vmatpush.bf16.msra.mxu1 %v4831_v13  ;;  %v4888_v13 = vld [vmem:[%s5994_s1 + $0x3e8] sm:$0xff] }
  0xd8   :  { %2526 = vmatpush.bf16.msra.mxu2 %v4841_v14  ;;  %v5848_v14 = vpop.f32.mrf.mxu2 }
  0xd9   :  { %2540 = vmatpush.bf16.msra.mxu3 %v4849_v16  ;;  %v4861_v16 = vld [vmem:[%s5994_s1 + $0x320] sm:$0xff] }
  0xda   :  { %2341 = vmatpush.bf16.msra.mxu0 %v4822_v30  ;;  %v5864_v22 = vpop.f32.mrf.mxu0  ;;  %v4859_v30 = vld [vmem:[%s5994_s1 + $0x310] sm:$0xff] }
  0xdb   :  { %2355 = vmatpush.bf16.msra.mxu1 %v4830_v31  ;;  %v5866_v23 = vpop.f32.mrf.mxu1  ;;  %v4867_v31 = vld [vmem:[%s5994_s1 + $0x350] sm:$0xff] }
  0xdc   :  { %2527 = vmatpush.bf16.msra.mxu2 %v4840_v35  ;;  %v2597_v35 = vunpack.c.l.b16 %v4387_v26 }
  0xdd   :  { %2541 = vmatpush.bf16.msra.mxu3 %v4848_v36  ;;  %v4885_v36 = vld [vmem:[%s5994_s1 + $0x3d0] sm:$0xff] }
  0xde   :  { %2342 = vmatpush.bf16.msra.mxu0 %v4821_v44  ;;  %v2784_v44 = vunpack.c.h.b16 %v4494_v29 }
  0xdf   :  { %2356 = vmatpush.bf16.msra.mxu1 %v4829_v45 }
  0xe0   :  { %2528 = vmatpush.bf16.msra.mxu2 %v4839_v46  ;;  %v5913_v45 = vpop.f32.mrf.mxu2  ;;  %v5915_v46 = vpop.f32.mrf.mxu3 }
  0xe1   :  { %2542 = vmatpush.bf16.msra.mxu3 %v4847_v47  ;;  %2343 = vmatmul.bf16.vlgmr.msra.gmra.mxu0 %v2233_v62  ;;  %v4874_v47 = vld [vmem:[%s5995_s0 + $0xac] sm:$0xf0]  ;;  %v4884_v62 = vld [vmem:[%s5994_s1 + $0x3c8] sm:$0xff] }
  0xe2   :  { %2707 = vmatpush.bf16.msrb.mxu0 %v4864_v52  ;;  %2357 = vmatmul.bf16.vlgmr.msra.gmra.mxu1 %v2236_v63  ;;  %v5926_v50 = vpop.f32.mrf.mxu0  ;;  %v4423_v52 = vor.u32 %v4856_v38, %v4422_v37  ;;  %v4530_v63 = vor.u32 %v4874_v47, %v4529_v43  ;;  %v525_v43 = vadd.f32 %v5828_v7, %v5826_v6 }
  0xe3   :  { %2721 = vmatpush.bf16.msrb.mxu1 %v4872_v53  ;;  %2529 = vmatmul.bf16.vlgmr.msra.gmra.mxu2 %v2419_v0  ;;  %v5928_v51 = vpop.f32.mrf.mxu1  ;;  %v2601_v53 = vpack.c.b16 %v2597_v35, %v2597_v35  ;;  %v4534_v0 = vor.u32 %v4873_v48, %v4531_v49  ;;  %v349_v35 = vadd.f32 %v5752_v21, %v5750_v20 }
  0xe4   :  { %2893 = vmatpush.bf16.msrb.mxu2 %v4882_v58  ;;  %2543 = vmatmul.bf16.vlgmr.msra.gmra.mxu3 %v2422_v1  ;;  %v2787_v58 = vpack.c.b16 %v2783_v40, %v2783_v40  ;;  %v2788_v1 = vpack.c.b16 %v2784_v44, %v2784_v44  ;;  %v701_v20 = vadd.f32 %v5850_v15, %v5848_v14 }
  0xe5   :  { %2907 = vmatpush.bf16.msrb.mxu3 %v4890_v59  ;;  %v4876_v59 = vld [vmem:[%s5994_s1 + $0x388] sm:$0xff]  ;;  %v703_v21 = vadd.f32 %v5915_v46, %v5913_v45  ;;  %v889_v34 = vadd.f32 %v5928_v51, %v5926_v50 }
  0xe6   :  { %2708 = vmatpush.bf16.msrb.mxu0 %v4863_v2  ;;  %v4857_v2 = vld [vmem:[%s5994_s1 + $0x300] sm:$0xff] }
  0xe7   :  { %2722 = vmatpush.bf16.msrb.mxu1 %v4871_v3  ;;  %v4865_v3 = vld [vmem:[%s5994_s1 + $0x340] sm:$0xff] }
  0xe8   :  { %2894 = vmatpush.bf16.msrb.mxu2 %v4881_v8  ;;  %v2603_v8 = vrot.slane %v4423_v52, 2 }
  0xe9   :  { %2908 = vmatpush.bf16.msrb.mxu3 %v4889_v9  ;;  %v2604_v9 = vrot.slane %v2601_v53, 2 }
  0xea   :  { %2709 = vmatpush.bf16.msrb.mxu0 %v4862_v10  ;;  %v2606_v10 = vrot.slane %v4427_v56, 2 }
  0xeb   :  { %2723 = vmatpush.bf16.msrb.mxu1 %v4870_v11  ;;  %v2607_v11 = vrot.slane %v2602_v57, 2  ;;  %v2605_v26 = vsel %vm760_vm0, %v2603_v8, %v2604_v9  ;;  %v890_v29 = vpop.f32.mrf.mxu1 }
  0xec   :  { %2895 = vmatpush.bf16.msrb.mxu2 %v4880_v12  ;;  %v4875_v12 = vld [vmem:[%s5994_s1 + $0x380] sm:$0xff] }
  0xed   :  { %2909 = vmatpush.bf16.msrb.mxu3 %v4888_v13  ;;  %v4883_v13 = vld [vmem:[%s5994_s1 + $0x3c0] sm:$0xff] }
  0xee   :  { %2710 = vmatpush.bf16.msrb.mxu0 %v4861_v16  ;;  %v2789_v16 = vrot.slane %v4530_v63, 2 }
  0xef   :  { %2724 = vmatpush.bf16.msrb.mxu1 %v4869_v17  ;;  %v2790_v17 = vrot.slane %v2787_v58, 2 }
  0xf0   :  { %2896 = vmatpush.bf16.msrb.mxu2 %v4879_v18  ;;  %v2792_v18 = vrot.slane %v4534_v0, 2 }
  0xf1   :  { %2910 = vmatpush.bf16.msrb.mxu3 %v4887_v19  ;;  %v2793_v19 = vrot.slane %v2788_v1, 2 }
  0xf2   :  { %2711 = vmatpush.bf16.msrb.mxu0 %v4860_v24  ;;  %v1061_v24 = vpop.f32.mrf.mxu2 }
  0xf3   :  { %2725 = vmatpush.bf16.msrb.mxu1 %v4868_v25  ;;  %v1075_v25 = vpop.f32.mrf.mxu3 }
  0xf4   :  { %2897 = vmatpush.bf16.msrb.mxu2 %v4878_v27  ;;  %v2608_v27 = vsel %vm760_vm0, %v2606_v10, %v2607_v11 }
  0xf5   :  { %2911 = vmatpush.bf16.msrb.mxu3 %v4886_v28  ;;  %v876_v28 = vpop.f32.mrf.mxu0 }
  0xf6   :  { %2712 = vmatpush.bf16.msrb.mxu0 %v4859_v30  ;;  %v2791_v30 = vsel %vm760_vm0, %v2789_v16, %v2790_v17  ;;  %v891_v60 = vadd.f32 %v890_v29, %v876_v28 }
  0xf7   :  { %2726 = vmatpush.bf16.msrb.mxu1 %v4867_v31  ;;  %v2794_v31 = vsel %vm760_vm0, %v2792_v18, %v2793_v19 }
  0xf8   :  { %2898 = vmatpush.bf16.msrb.mxu2 %v4877_v32  ;;  %v177_v32 = vadd.f32 %v5712_v5, %v5710_v4  ;;  %v527_v4 = vadd.f32 %v5866_v23, %v5864_v22  ;;  %v356_v5 = vadd.f32 %v351_v42, %v179_v41  ;;  %v1076_v22 = vadd.f32 %v1075_v25, %v1061_v24 }
  0xf9   :  { %2912 = vmatpush.bf16.msrb.mxu3 %v4885_v36 }
  0xfa   :  { %2713 = vmatpush.bf16.msrb.mxu0 %v4858_v54  ;;  %v1063_v36 = vpop.f32.mrf.mxu2  ;;  %v355_v40 = vadd.f32 %v349_v35, %v177_v32  ;;  %v532_v33 = vadd.f32 %v527_v4, %v356_v5 }
  0xfb   :  { %2727 = vmatpush.bf16.msrb.mxu1 %v4866_v55  ;;  %v1077_v37 = vpop.f32.mrf.mxu3 }
  0xfc   :  { %2899 = vmatpush.bf16.msrb.mxu2 %v4876_v59  ;;  %v531_v44 = vadd.f32 %v525_v43, %v355_v40  ;;  %v708_v49 = vadd.f32 %v703_v21, %v532_v33  ;;  %v1078_v23 = vadd.f32 %v1077_v37, %v1063_v36 }
  0xfd   :  { %2913 = vmatpush.bf16.msrb.mxu3 %v4884_v62 }
  0xfe   :  { %2714 = vmatpush.bf16.msrb.mxu0 %v4857_v2  ;;  %v1248_v38 = vpop.f32.mrf.mxu0  ;;  %v707_v7 = vadd.f32 %v701_v20, %v531_v44  ;;  %v896_v53 = vadd.f32 %v891_v60, %v708_v49 }
  0xff   :  { %2728 = vmatpush.bf16.msrb.mxu1 %v4865_v3  ;;  %v1262_v39 = vpop.f32.mrf.mxu1 }
 0x100   :  { %2900 = vmatpush.bf16.msrb.mxu2 %v4875_v12  ;;  %v895_v52 = vadd.f32 %v889_v34, %v707_v7  ;;  %v1263_v54 = vadd.f32 %v1262_v39, %v1248_v38  ;;  %v1083_v55 = vadd.f32 %v1078_v23, %v896_v53 }
 0x101   :  { %2914 = vmatpush.bf16.msrb.mxu3 %v4883_v13  ;;  %2715 = vmatmul.bf16.vlgmr.msrb.gmra.mxu0 %v2605_v26 }
 0x102   :  { %2729 = vmatmul.bf16.vlgmr.msrb.gmra.mxu1 %v2608_v27  ;;  %v1082_v15 = vadd.f32 %v1076_v22, %v895_v52 }
 0x103   :  { %2901 = vmatmul.bf16.vlgmr.msrb.gmra.mxu2 %v2791_v30 }
 0x104   :  { %2915 = vmatmul.bf16.vlgmr.msrb.gmra.mxu3 %v2794_v31  ;;  %v1269_v57 = vadd.f32 %v1263_v54, %v1082_v15 }
 0x106   :  { %v1435_v47 = vpop.f32.mrf.mxu2  ;;  %v1250_v61 = vpop.f32.mrf.mxu0 }
 0x107   :  { %v1449_v48 = vpop.f32.mrf.mxu3  ;;  %v1264_v6 = vpop.f32.mrf.mxu1 }
 0x108   :  { %v1265_v14 = vadd.f32 %v1264_v6, %v1250_v61  ;;  %v1450_v45 = vadd.f32 %v1449_v48, %v1435_v47 }
 0x10a   :  { %v1270_v58 = vadd.f32 %v1265_v14, %v1083_v55  ;;  %v1456_v50 = vadd.f32 %v1450_v45, %v1269_v57 }
 0x10e   :  { %v1437_v46 = vpop.f32.mrf.mxu2 }
 0x10f   :  { %v1451_v56 = vpop.f32.mrf.mxu3 }
 0x110   :  { %v1452_v59 = vadd.f32 %v1451_v56, %v1437_v46 }
 0x112   :  { %v1457_v51 = vadd.f32 %v1452_v59, %v1270_v58 }
 0x114   :  { %v4894_v62 = vpack.c.bf16 %v1457_v51, %v1456_v50  ;;  %v1466_v63 = vadd.f32 %v1457_v51, %v1456_v50 }
 0x116   :  { %4895 = vst [vmem:[%s5996_s2] sm:$0xff] %v4894_v62   ;;  %v1467_v0 = vrot.slane %v1466_v63, 4 }
 0x118   :  { %v1468_v1 = vadd.f32 %v1467_v0, %v1466_v63 }
 0x11a   :  { %v1469_v2 = vrot.slane %v1468_v1, 2 }
 0x11c   :  { %v1470_v3 = vadd.f32 %v1469_v2, %v1468_v1 }
 0x11e   :  { %v1471_v8 = vrot.slane %v1470_v3, 1  ;;  %v1637_v28 = vpop.f32.mrf.mxu0 }
 0x11f   :  { %v1651_v29 = vpop.f32.mrf.mxu1 }
 0x120   :  { %v1472_v9 = vadd.f32 %v1471_v8, %v1470_v3  ;;  %v1652_v34 = vadd.f32 %v1651_v29, %v1637_v28 }
 0x122   :  { %v1473_v10 = vmul.f32 0.0625, %v1472_v9  ;;  %1476 = vst [vmem:[%s5997_s3] sm:$0x1] %v1472_v9 }
 0x124   :  { %v1474_v11 = vsub.f32 %v1456_v50, %v1473_v10  ;;  %v1475_v12 = vsub.f32 %v1457_v51, %v1473_v10 }
 0x126   :  { %v1477_v13 = vmul.f32 %v1474_v11, %v1474_v11  ;;  %v1478_v16 = vmul.f32 %v1475_v12, %v1475_v12  ;;  %v1808_v30 = vpop.f32.mrf.mxu2  ;;  %v1639_v32 = vpop.f32.mrf.mxu0 }
 0x127   :  { %v1822_v31 = vpop.f32.mrf.mxu3  ;;  %v1653_v35 = vpop.f32.mrf.mxu1 }
 0x128   :  { %v1479_v17 = vadd.f32 %v1478_v16, %v1477_v13  ;;  %v1823_v60 = vadd.f32 %v1822_v31, %v1808_v30  ;;  %v1654_v23 = vadd.f32 %v1653_v35, %v1639_v32 }
 0x12a   :  { %v1480_v18 = vrot.slane %v1479_v17, 4  ;;  %v1829_v22 = vadd.f32 %v1823_v60, %v1652_v34 }
 0x12c   :  { %v1481_v19 = vadd.f32 %v1480_v18, %v1479_v17 }
 0x12e   :  { %v1482_v24 = vrot.slane %v1481_v19, 2  ;;  %v1810_v36 = vpop.f32.mrf.mxu2 }
 0x12f   :  { %v1824_v37 = vpop.f32.mrf.mxu3 }
 0x130   :  { %v1483_v25 = vadd.f32 %v1482_v24, %v1481_v19  ;;  %v1825_v52 = vadd.f32 %v1824_v37, %v1810_v36 }
 0x132   :  { %v1484_v26 = vrot.slane %v1483_v25, 1  ;;  %v1830_v14 = vadd.f32 %v1825_v52, %v1654_v23 }
 0x134   :  { %v1485_v27 = vadd.f32 %v1484_v26, %v1483_v25 }
 0x136   :  { %1486 = vst [vmem:[%s5997_s3 + $0x1] sm:$0x1] %v1485_v27 }
 0x13e   :  { %v1983_v38 = vpop.f32.mrf.mxu0 }
 0x13f   :  { %v1997_v39 = vpop.f32.mrf.mxu1 }
 0x140   :  { %v1998_v53 = vadd.f32 %v1997_v39, %v1983_v38 }
 0x142   :  { %v2004_v15 = vadd.f32 %v1998_v53, %v1829_v22 }
 0x146   :  { %v2158_v40 = vpop.f32.mrf.mxu2  ;;  %v1985_v42 = vpop.f32.mrf.mxu0 }
 0x147   :  { %v2172_v41 = vpop.f32.mrf.mxu3  ;;  %v1999_v43 = vpop.f32.mrf.mxu1 }
 0x148   :  { %v2000_v54 = vadd.f32 %v1999_v43, %v1985_v42  ;;  %v2173_v55 = vadd.f32 %v2172_v41, %v2158_v40 }
 0x14a   :  { %v2005_v57 = vadd.f32 %v2000_v54, %v1830_v14  ;;  %v2179_v62 = vadd.f32 %v2173_v55, %v2004_v15 }
 0x14e   :  { %v2160_v4 = vpop.f32.mrf.mxu2 }
 0x14f   :  { %v2174_v5 = vpop.f32.mrf.mxu3 }
 0x150   :  { %v2175_v45 = vadd.f32 %v2174_v5, %v2160_v4 }
 0x152   :  { %v2180_v63 = vadd.f32 %v2175_v45, %v2005_v57 }
 0x15e   :  { %v2344_v44 = vpop.f32.mrf.mxu0 }
 0x15f   :  { %v2358_v20 = vpop.f32.mrf.mxu1 }
 0x160   :  { %v2359_v58 = vadd.f32 %v2358_v20, %v2344_v44 }
 0x162   :  { %v2365_v2 = vadd.f32 %v2359_v58, %v2179_v62 }
 0x166   :  { %v2530_v21 = vpop.f32.mrf.mxu2  ;;  %v2346_v48 = vpop.f32.mrf.mxu0 }
 0x167   :  { %v2544_v47 = vpop.f32.mrf.mxu3  ;;  %v2360_v33 = vpop.f32.mrf.mxu1 }
 0x168   :  { %v2361_v59 = vadd.f32 %v2360_v33, %v2346_v48  ;;  %v2545_v0 = vadd.f32 %v2544_v47, %v2530_v21 }
 0x16a   :  { %v2366_v3 = vadd.f32 %v2361_v59, %v2180_v63  ;;  %v2551_v10 = vadd.f32 %v2545_v0, %v2365_v2 }
 0x16e   :  { %v2532_v61 = vpop.f32.mrf.mxu2 }
 0x16f   :  { %v2546_v6 = vpop.f32.mrf.mxu3 }
 0x170   :  { %v2547_v1 = vadd.f32 %v2546_v6, %v2532_v61 }
 0x172   :  { %v2552_v11 = vadd.f32 %v2547_v1, %v2366_v3 }
 0x17e   :  { %v2716_v7 = vpop.f32.mrf.mxu0 }
 0x17f   :  { %v2730_v49 = vpop.f32.mrf.mxu1 }
 0x180   :  { %v2731_v8 = vadd.f32 %v2730_v49, %v2716_v7 }
 0x182   :  { %v2737_v17 = vadd.f32 %v2731_v8, %v2551_v10 }
 0x186   :  { %v2902_v46 = vpop.f32.mrf.mxu2  ;;  %v2718_v50 = vpop.f32.mrf.mxu0 }
 0x187   :  { %v2916_v56 = vpop.f32.mrf.mxu3  ;;  %v2732_v51 = vpop.f32.mrf.mxu1 }
 0x188   :  { %v2733_v9 = vadd.f32 %v2732_v51, %v2718_v50  ;;  %v2917_v12 = vadd.f32 %v2916_v56, %v2902_v46 }
 0x18a   :  { %v2738_v18 = vadd.f32 %v2733_v9, %v2552_v11  ;;  %v2923_v24 = vadd.f32 %v2917_v12, %v2737_v17 }
 0x18e   :  { %v2904_v13 = vpop.f32.mrf.mxu2 }
 0x18f   :  { %v2918_v16 = vpop.f32.mrf.mxu3 }
 0x190   :  { %v2919_v19 = vadd.f32 %v2918_v16, %v2904_v13 }
 0x192   :  { %v2924_v25 = vadd.f32 %v2919_v19, %v2738_v18 }
 0x194   :  { %v4899_v26 = vpack.c.bf16 %v2924_v25, %v2923_v24  ;;  %v2934_v27 = vadd.f32 %v2924_v25, %v2923_v24 }
 0x196   :  { %4901 = vst [vmem:[%s5996_s2 + $0x8] sm:$0xff] %v4899_v26   ;;  %v2935_v28 = vrot.slane %v2934_v27, 4 }
 0x198   :  { %v2936_v29 = vadd.f32 %v2935_v28, %v2934_v27 }
 0x19a   :  { %v2937_v30 = vrot.slane %v2936_v29, 2 }
 0x19c   :  { %v2938_v31 = vadd.f32 %v2937_v30, %v2936_v29 }
 0x19e   :  { %v2939_v32 = vrot.slane %v2938_v31, 1 }
 0x1a0   :  { %v2940_v35 = vadd.f32 %v2939_v32, %v2938_v31 }
 0x1a2   :  { %v2941_v36 = vmul.f32 0.0625, %v2940_v35  ;;  %4601 = vst [vmem:[%s5997_s3 + $0x2] sm:$0x1] %v2940_v35 }
 0x1a4   :  { %v2942_v37 = vsub.f32 %v2923_v24, %v2941_v36  ;;  %v2943_v38 = vsub.f32 %v2924_v25, %v2941_v36 }
 0x1a6   :  { %v2946_v39 = vmul.f32 %v2942_v37, %v2942_v37  ;;  %v2947_v40 = vmul.f32 %v2943_v38, %v2943_v38 }
 0x1a8   :  { %v2948_v41 = vadd.f32 %v2947_v40, %v2946_v39 }
 0x1aa   :  { %v2949_v42 = vrot.slane %v2948_v41, 4 }
 0x1ac   :  { %v2950_v43 = vadd.f32 %v2949_v42, %v2948_v41 }
 0x1ae   :  { %v2951_v4 = vrot.slane %v2950_v43, 2 }
 0x1b0   :  { %v2952_v5 = vadd.f32 %v2951_v4, %v2950_v43 }
 0x1b2   :  { %v2953_v44 = vrot.slane %v2952_v5, 1 }
 0x1b4   :  { %v2954_v20 = vadd.f32 %v2953_v44, %v2952_v5 }
 0x1b6   :  { %4602 = vst [vmem:[%s5997_s3 + $0x3] sm:$0x1] %v2954_v20 }

</bundles_post_ra>
